<compile_context>
chip_gen: v5e
topology: v5e:2x2
jax: 0.10.0
libtpu: 0.0.40
codegen_flags: <defaults>
</compile_context>

<pallas_src>
import functools

import jax
import jax.numpy as jnp
from jax import lax
from jax.experimental import pallas as pl
from jax.experimental.pallas import tpu as pltpu


# --------------------------- generation-aware config --------------------------- #

def _generation_settings():
    kind = ""
    try:
        kind = jax.devices()[0].device_kind.lower()
    except Exception:
        pass
    if "v7" in kind:
        # 64 MiB physical VMEM, 2 TensorCores: smaller cap, more grid steps so each
        # core gets >=4 steps and double-buffering has something to overlap.
        return dict(vmem_limit=48 * 1024 * 1024, tile_target=512,
                    min_steps=8, row_tiles=4)
    if "v5" in kind or "v6" in kind:
        # 128 MiB physical VMEM, 1 TensorCore: bigger M tiles, higher vmem cap.
        return dict(vmem_limit=96 * 1024 * 1024, tile_target=1024,
                    min_steps=2, row_tiles=2)
    # Unknown backend: keep the previously validated conservative settings.
    return dict(vmem_limit=32 * 1024 * 1024, tile_target=512,
                min_steps=2, row_tiles=2)


def _pick_tile_m(M, target, min_steps):
    """Largest multiple-of-8 divisor of M <= target, keeping >= min_steps grid steps
    when M permits (pipelining / TensorCore sharding)."""
    cap = min(target, M)
    if min_steps > 1 and M // min_steps >= 8:
        cap = min(cap, M // min_steps)
    for d in range(cap, 7, -1):
        if M % d == 0 and d % 8 == 0:
            return d
    return M  # pathological M (tiny / prime): single block


def _pick_row_tile(H, want_tiles):
    """Multiple-of-8 divisor of H giving >= want_tiles row tiles when possible."""
    cands = [d for d in range(8, H + 1, 8) if H % d == 0]
    if not cands:
        return H
    for w in range(want_tiles, 0, -1):
        ok = [d for d in cands if H // d >= w]
        if ok:
            return max(ok)
    return H


# ------------------ Kernel 1: fused conv1 (1x1) + conv2 (3x3) ------------------ #

def _conv1_conv2_kernel(xp_ref, w1_ref, w2_ref, o_ref, h1_scratch, *,
                        Wp, W, th, stride, out_rows):
    """Per (image, row-tile): h1 = relu(xp_rows @ w1); conv2 = 3 fat matmuls (one
    per ky, three kx-shifted slices concatenated along channels); compact store.

    xp_ref : (1, Hp*Wp, Cin)  circularly padded image, rows flattened (full image,
                              resident across the row-tile axis)
    w1_ref : (Cin, P)
    w2_ref : (3, 3*P, P)      per-ky slabs, rows ordered (kx, cin)
    o_ref  : (1, out_rows*W, P) compact output rows for this tile
    h1_scratch : ((th+2)*Wp + 8, P)
    th        : dense output h-rows covered per grid step (== H when stride > 1)
    out_rows  : h-rows actually stored (th for stride 1, ceil(H/stride) otherwise)
    """
    P = w1_ref.shape[1]
    rows_in = (th + 2) * Wp            # padded h1 rows this tile needs
    rows_dense = th * Wp               # dense conv2 positions (incl. wrap columns)

    t = pl.program_id(1)
    row0 = t * (th * Wp)
    if (th * Wp) % 8 == 0:
        row0 = pl.multiple_of(row0, 8)

    # conv1 is pointwise, so it commutes with circular padding: applying it to the
    # padded rows directly gives the padded h1 for this row window.
    xw = xp_ref[0, pl.ds(row0, rows_in), :]
    h1_scratch[0:rows_in, :] = jnp.maximum(
        jnp.dot(xw, w1_ref[...], preferred_element_type=jnp.float32), 0.0)
    # Small zero tail: shifted tap reads of dropped wrap-column outputs can overrun
    # rows_in by up to 2 rows; keep them finite (valid outputs never read the tail).
    h1_scratch[rows_in:rows_in + 8, :] = jnp.zeros((8, P), jnp.float32)

    # conv2: 3 matmuls with K = 3P instead of 9 with K = P (better MXU fill, fewer
    # unaligned slice copies).
    acc = jnp.zeros((rows_dense, P), jnp.float32)
    for ky in range(3):
        base = ky * Wp
        lhs = jnp.concatenate(
            [h1_scratch[base + kx:base + kx + rows_dense, :] for kx in range(3)],
            axis=-1)                                        # (rows_dense, 3P)
        acc = acc + jnp.dot(lhs, w2_ref[ky],
                            preferred_element_type=jnp.float32)
    h2 = jnp.maximum(acc, 0.0)

    # Compact store while the tile is still in VMEM: drop the two wrap columns per
    # row and (for stride > 1) keep only every stride-th row.  No host-side gather
    # and no extra HBM round trip of the padded-width activation.
    for r in range(out_rows):
        src = r * stride * Wp
        o_ref[0, r * W:(r + 1) * W, :] = h2[src:src + W, :].astype(o_ref.dtype)


def fused_conv1_conv2(x_nhwc, w1, w2, stride, settings):
    """conv1(1x1)+ReLU then conv2(3x3, circular pad=1, stride)+ReLU -> (N,Ho,Wo,P)."""
    N, H, W, Cin = x_nhwc.shape
    P = w1.shape[1]
    Hp, Wp = H + 2, W + 2

    # Only the circular wrap pad is done on the host (the +8 tap-overrun pad of the
    # old version now lives purely in the VMEM scratch).
    xp = jnp.pad(x_nhwc, ((0, 0), (1, 1), (1, 1), (0, 0)), mode="wrap")
    xp_flat = xp.reshape(N, Hp * Wp, Cin)

    if stride == 1:
        th = _pick_row_tile(H, settings["row_tiles"])
        out_rows = th
        n_tiles = H // th
    else:
        th = H
        out_rows = (H - 1) // stride + 1        # Ho
        n_tiles = 1
    rows_in = (th + 2) * Wp
    w2_slab = w2.reshape(3, 3 * P, P)           # per-ky (kx, cin)-ordered rows

    out = pl.pallas_call(
        functools.partial(_conv1_conv2_kernel, Wp=Wp, W=W, th=th,
                          stride=stride, out_rows=out_rows),
        out_shape=jax.ShapeDtypeStruct((N, n_tiles * out_rows * W, P), jnp.float32),
        grid=(N, n_tiles),
        in_specs=[
            pl.BlockSpec((1, Hp * Wp, Cin), lambda n, t: (n, 0, 0)),
            pl.BlockSpec((Cin, P), lambda n, t: (0, 0)),
            pl.BlockSpec((3, 3 * P, P), lambda n, t: (0, 0, 0)),
        ],
        out_specs=pl.BlockSpec((1, out_rows * W, P), lambda n, t: (n, t, 0)),
        scratch_shapes=[pltpu.VMEM((rows_in + 8, P), jnp.float32)],
        compiler_params=pltpu.CompilerParams(
            dimension_semantics=("parallel", "parallel"),
            vmem_limit_bytes=settings["vmem_limit"]),
    )(xp_flat, w1, w2_slab)

    if stride == 1:
        return out.reshape(N, H, W, P)
    # stride > 1: rows were subsampled in-kernel; drop the strided columns here.
    # TODO(synk): fully strided in-kernel tap reads / column subsample would also
    # remove the remaining dense compute and this small host-side column gather.
    return out.reshape(N, out_rows, W, P)[:, :, ::stride, :]


# ------- Kernel 2: shortcut-conv batch statistics (cross-tile Welford) ------- #

def _shortcut_stats_kernel(xs_ref, wsc_ref, mean_ref, m2_ref, *, tm):
    i = pl.program_id(0)

    @pl.when(i == 0)
    def _():
        mean_ref[...] = jnp.zeros_like(mean_ref)
        m2_ref[...] = jnp.zeros_like(m2_ref)

    sc = jnp.dot(xs_ref[...], wsc_ref[...], preferred_element_type=jnp.float32)
    m_t = jnp.mean(sc, axis=0, keepdims=True)                 # (1, C4) tile mean
    m2_t = jnp.sum((sc - m_t) ** 2, axis=0, keepdims=True)    # (1, C4) tile M2

    # Chan/Welford parallel combine: numerically safe vs. E[x^2] - mean^2.
    n_prev = (i * tm).astype(jnp.float32)
    n_tile = jnp.float32(tm)
    n_new = n_prev + n_tile
    delta = m_t - mean_ref[...]
    mean_ref[...] += delta * (n_tile / n_new)
    m2_ref[...] += m2_t + delta * delta * (n_prev * n_tile / n_new)


def shortcut_batch_stats(xs, wsc, tm, vmem_limit):
    M, Cin = xs.shape
    C4 = wsc.shape[1]
    return pl.pallas_call(
        functools.partial(_shortcut_stats_kernel, tm=tm),
        out_shape=(jax.ShapeDtypeStruct((1, C4), jnp.float32),
                   jax.ShapeDtypeStruct((1, C4), jnp.float32)),
        grid=(M // tm,),
        in_specs=[pl.BlockSpec((tm, Cin), lambda i: (i, 0)),
                  pl.BlockSpec((Cin, C4), lambda i: (0, 0))],
        out_specs=(pl.BlockSpec((1, C4), lambda i: (0, 0)),
                   pl.BlockSpec((1, C4), lambda i: (0, 0))),
        compiler_params=pltpu.CompilerParams(
            dimension_semantics=("arbitrary",),
            vmem_limit_bytes=vmem_limit),
    )(xs, wsc)


# ------ Kernel 3: fused conv3 + shortcut conv + BN apply + residual + ReLU ----- #

def _tail_bn_kernel(h2_ref, xs_ref, w3_ref, wsc_ref, scale_ref, shift_ref, o_ref):
    h3 = jnp.dot(h2_ref[...], w3_ref[...], preferred_element_type=jnp.float32)
    sc = jnp.dot(xs_ref[...], wsc_ref[...], preferred_element_type=jnp.float32)
    o_ref[...] = jnp.maximum(h3 + sc * scale_ref[...] + shift_ref[...],
                             0.0).astype(o_ref.dtype)


def fused_tail_shortcut_bn(h2, xs, w3, wsc, scale, shift, tm, vmem_limit):
    M, P = h2.shape
    Cin = xs.shape[1]
    C4 = w3.shape[1]
    return pl.pallas_call(
        _tail_bn_kernel,
        out_shape=jax.ShapeDtypeStruct((M, C4), jnp.float32),
        grid=(M // tm,),
        in_specs=[
            pl.BlockSpec((tm, P), lambda i: (i, 0)),
            pl.BlockSpec((tm, Cin), lambda i: (i, 0)),
            pl.BlockSpec((P, C4), lambda i: (0, 0)),
            pl.BlockSpec((Cin, C4), lambda i: (0, 0)),
            pl.BlockSpec((1, C4), lambda i: (0, 0)),
            pl.BlockSpec((1, C4), lambda i: (0, 0)),
        ],
        out_specs=pl.BlockSpec((tm, C4), lambda i: (i, 0)),
        compiler_params=pltpu.CompilerParams(
            dimension_semantics=("parallel",),
            vmem_limit_bytes=vmem_limit),
    )(h2, xs, w3, wsc, scale, shift)


def _tail_identity_kernel(h2_ref, res_ref, w3_ref, o_ref):
    h3 = jnp.dot(h2_ref[...], w3_ref[...], preferred_element_type=jnp.float32)
    o_ref[...] = jnp.maximum(h3 + res_ref[...], 0.0).astype(o_ref.dtype)


def fused_tail_identity(h2, res, w3, tm, vmem_limit):
    M, P = h2.shape
    C4 = w3.shape[1]
    return pl.pallas_call(
        _tail_identity_kernel,
        out_shape=jax.ShapeDtypeStruct((M, C4), jnp.float32),
        grid=(M // tm,),
        in_specs=[pl.BlockSpec((tm, P), lambda i: (i, 0)),
                  pl.BlockSpec((tm, C4), lambda i: (i, 0)),
                  pl.BlockSpec((P, C4), lambda i: (0, 0))],
        out_specs=pl.BlockSpec((tm, C4), lambda i: (i, 0)),
        compiler_params=pltpu.CompilerParams(
            dimension_semantics=("parallel",),
            vmem_limit_bytes=vmem_limit),
    )(h2, res, w3)


# --------------------------------- forward ---------------------------------- #

def bottleneck_nobn_forward_nhwc(x_nhwc, params, stride, settings=None, eps=1e-5):
    if settings is None:
        settings = _generation_settings()
    N, H, W, Cin = x_nhwc.shape
    P = params["w1"].shape[1]
    C4 = params["w3"].shape[1]

    h2 = fused_conv1_conv2(x_nhwc, params["w1"], params["w2"], stride, settings)
    _, Ho, Wo, _ = h2.shape
    M = N * Ho * Wo
    h2m = h2.reshape(M, P)
    xs = x_nhwc[:, ::stride, ::stride, :].reshape(M, Cin)
    tm = _pick_tile_m(M, settings["tile_target"], settings["min_steps"])

    if stride != 1 or Cin != C4:
        mean, m2 = shortcut_batch_stats(xs, params["wsc"], tm,
                                        settings["vmem_limit"])
        var = m2 * (1.0 / M)                          # biased variance (BN training)
        scale = params["bn_gamma"].reshape(1, C4) * lax.rsqrt(var + eps)
        shift = params["bn_beta"].reshape(1, C4) - mean * scale
        out = fused_tail_shortcut_bn(h2m, xs, params["w3"], params["wsc"],
                                     scale, shift, tm, settings["vmem_limit"])
    else:
        out = fused_tail_identity(h2m, xs, params["w3"], tm,
                                  settings["vmem_limit"])

    return out.reshape(N, Ho, Wo, C4)


def bottleneck_nobn_forward(x_nchw, params, stride):
    # Layout conversion only at the module boundary (a full model would stay NHWC).
    x = jnp.transpose(x_nchw, (0, 2, 3, 1))
    out = bottleneck_nobn_forward_nhwc(x, params, stride)
    return jnp.transpose(out, (0, 3, 1, 2))


# --------------------------- pure-JAX reference ------------------------------ #

def ref_forward(x_nchw, params, stride, eps=1e-5):
    x = jnp.transpose(x_nchw, (0, 2, 3, 1))
    dn = ("NHWC", "HWIO", "NHWC")
    prec = lax.Precision.HIGHEST
    w1 = params["w1"][None, None]
    h1 = jax.nn.relu(lax.conv_general_dilated(x, w1, (1, 1), "VALID",
                                              dimension_numbers=dn, precision=prec))
    h1p = jnp.pad(h1, ((0, 0), (1, 1), (1, 1), (0, 0)), mode="wrap")
    h2 = jax.nn.relu(lax.conv_general_dilated(h1p, params["w2"], (stride, stride),
                                              "VALID", dimension_numbers=dn,
                                              precision=prec))
    w3 = params["w3"][None, None]
    h3 = lax.conv_general_dilated(h2, w3, (1, 1), "VALID",
                                  dimension_numbers=dn, precision=prec)
    Cin, C4 = x.shape[-1], params["w3"].shape[1]
    if stride != 1 or Cin != C4:
        wsc = params["wsc"][None, None]
        sc = lax.conv_general_dilated(x, wsc, (stride, stride), "VALID",
                                      dimension_numbers=dn, precision=prec)
        mean = jnp.mean(sc, axis=(0, 1, 2), keepdims=True)
        var = jnp.mean((sc - mean) ** 2, axis=(0, 1, 2), keepdims=True)
        sc = (sc - mean) * lax.rsqrt(var + eps) * params["bn_gamma"] + params["bn_beta"]
    else:
        sc = x
    out = jax.nn.relu(h3 + sc)
    return jnp.transpose(out, (0, 3, 1, 2))


# ----------------------------------- main ------------------------------------ #

if __name__ == "__main__":
    # TODO(synk): BatchNorm running-stat buffer updates are not modeled; the forward
    # uses training-mode batch statistics (matching a freshly-constructed module).

    def run_case(key, in_planes, planes, stride, N=2, H=16, W=16):
        C4 = 4 * planes
        k1, k2, k3, k4, kx = jax.random.split(key, 5)
        params = {
            "w1": jax.random.normal(k1, (in_planes, planes), jnp.float32) * 0.1,
            "w2": jax.random.normal(k2, (3, 3, planes, planes), jnp.float32) * 0.1,
            "w3": jax.random.normal(k3, (planes, C4), jnp.float32) * 0.1,
        }
        if stride != 1 or in_planes != C4:
            params["wsc"] = jax.random.normal(k4, (in_planes, C4), jnp.float32) * 0.1
            params["bn_gamma"] = jnp.ones((C4,), jnp.float32)
            params["bn_beta"] = jnp.zeros((C4,), jnp.float32)
        x = jax.random.normal(kx, (N, in_planes, H, W), jnp.float32)

        out = jax.block_until_ready(bottleneck_nobn_forward(x, params, stride))
        ref = jax.block_until_ready(ref_forward(x, params, stride))
        Ho = (H - 1) // stride + 1
        Wo = (W - 1) // stride + 1
        assert out.shape == (N, C4, Ho, Wo), out.shape
        assert jnp.allclose(out, ref, atol=2e-3, rtol=1e-3), \
            f"mismatch (in_planes={in_planes}, planes={planes}, stride={stride})"

    key = jax.random.PRNGKey(0)
    kA, kB, kC = jax.random.split(key, 3)
    run_case(kA, in_planes=16, planes=8, stride=1)   # projection shortcut (conv + BN)
    run_case(kB, in_planes=32, planes=8, stride=1)   # identity shortcut
    run_case(kC, in_planes=16, planes=8, stride=2)   # strided projection shortcut
    print("KERNEL_OK")
</pallas_src>

<mosaic_0001>
module attributes {stable_mosaic.version = 11 : i64} {
  func.func @_conv1_conv2_kernel(%arg0: i32, %arg1: i32, %arg2: memref<1x324x16xf32, #tpu.memory_space<vmem>>, %arg3: memref<16x8xf32, #tpu.memory_space<vmem>>, %arg4: memref<3x24x8xf32, #tpu.memory_space<vmem>>, %arg5: memref<1x128x8xf32, #tpu.memory_space<vmem>>, %arg6: memref<188x8xf32, #tpu.memory_space<vmem>>) attributes {dimension_semantics = [#tpu.dimension_semantics<parallel>, #tpu.dimension_semantics<parallel>], iteration_bounds = array<i64: 2, 2>, scalar_prefetch = 0 : i64, scratch_operands = 1 : i64, tpu.core_type = #tpu.core_type<tc>, window_params = [{transform_indices = @transform_0, window_bounds = array<i64: 1, 324, 16>}, {pipeline_mode = #tpu.pipeline_mode<synchronous>, transform_indices = @transform_1, window_bounds = array<i64: 16, 8>}, {pipeline_mode = #tpu.pipeline_mode<synchronous>, transform_indices = @transform_2, window_bounds = array<i64: 3, 24, 8>}, {transform_indices = @transform_3, window_bounds = array<i64: 1, 128, 8>}]} {
    %c144_i32 = arith.constant 144 : i32
    %0 = arith.muli %arg1, %c144_i32 : i32
    %1 = tpu.assume_multiple %0, 8 : i32
    %c0 = arith.constant 0 : index
    %2 = arith.index_cast %1 : i32 to index
    %c0_0 = arith.constant 0 : index
    %3 = vector.load %arg2[%c0, %2, %c0_0] : memref<1x324x16xf32, #tpu.memory_space<vmem>>, vector<1x180x16xf32>
    %4 = vector.shape_cast %3 : vector<1x180x16xf32> to vector<180x16xf32>
    %c0_1 = arith.constant 0 : index
    %c0_2 = arith.constant 0 : index
    %5 = vector.load %arg3[%c0_1, %c0_2] : memref<16x8xf32, #tpu.memory_space<vmem>>, vector<16x8xf32>
    %cst = arith.constant dense<0.000000e+00> : vector<180x8xf32>
    %6 = tpu.matmul %4, %5, %cst {dimension_numbers = #tpu.dot_dimension_numbers<[1], [0], [0], [1], [0, 0, 1, 1], [], []>} : vector<180x16xf32>, vector<16x8xf32>, vector<180x8xf32> -> vector<180x8xf32>
    %cst_3 = arith.constant 0.000000e+00 : f32
    %7 = vector.broadcast %cst_3 : f32 to vector<180x8xf32>
    %8 = arith.maximumf %6, %7 : vector<180x8xf32>
    %c0_4 = arith.constant 0 : index
    %c0_5 = arith.constant 0 : index
    %9 = vector.load %arg6[%c0_4, %c0_5] : memref<188x8xf32, #tpu.memory_space<vmem>>, vector<180x8xf32>
    tpu.vector_store %arg6[%c0_4, %c0_5], %8 {strides = array<i32>} : memref<188x8xf32, #tpu.memory_space<vmem>>, vector<180x8xf32>,
    %cst_6 = arith.constant 0.000000e+00 : f32
    %10 = vector.broadcast %cst_6 : f32 to vector<8x8xf32>
    %c180 = arith.constant 180 : index
    %c0_7 = arith.constant 0 : index
    %11 = vector.load %arg6[%c180, %c0_7] : memref<188x8xf32, #tpu.memory_space<vmem>>, vector<8x8xf32>
    tpu.vector_store %arg6[%c180, %c0_7], %10 {strides = array<i32>} : memref<188x8xf32, #tpu.memory_space<vmem>>, vector<8x8xf32>,
    %cst_8 = arith.constant 0.000000e+00 : f32
    %12 = vector.broadcast %cst_8 : f32 to vector<144x8xf32>
    %c0_9 = arith.constant 0 : index
    %c0_10 = arith.constant 0 : index
    %13 = vector.load %arg6[%c0_9, %c0_10] : memref<188x8xf32, #tpu.memory_space<vmem>>, vector<144x8xf32>
    %c1 = arith.constant 1 : index
    %c0_11 = arith.constant 0 : index
    %14 = vector.load %arg6[%c1, %c0_11] : memref<188x8xf32, #tpu.memory_space<vmem>>, vector<144x8xf32>
    %c2 = arith.constant 2 : index
    %c0_12 = arith.constant 0 : index
    %15 = vector.load %arg6[%c2, %c0_12] : memref<188x8xf32, #tpu.memory_space<vmem>>, vector<144x8xf32>
    %16 = tpu.concatenate %13, %14, %15 in 1 : vector<144x8xf32>, vector<144x8xf32>, vector<144x8xf32> -> vector<144x24xf32>
    %c0_13 = arith.constant 0 : index
    %c0_14 = arith.constant 0 : index
    %c0_15 = arith.constant 0 : index
    %17 = vector.load %arg4[%c0_13, %c0_14, %c0_15] : memref<3x24x8xf32, #tpu.memory_space<vmem>>, vector<1x24x8xf32>
    %18 = vector.shape_cast %17 : vector<1x24x8xf32> to vector<24x8xf32>
    %cst_16 = arith.constant dense<0.000000e+00> : vector<144x8xf32>
    %19 = tpu.matmul %16, %18, %cst_16 {dimension_numbers = #tpu.dot_dimension_numbers<[1], [0], [0], [1], [0, 0, 1, 1], [], []>} : vector<144x24xf32>, vector<24x8xf32>, vector<144x8xf32> -> vector<144x8xf32>
    %20 = arith.addf %12, %19 : vector<144x8xf32>
    %c18 = arith.constant 18 : index
    %c0_17 = arith.constant 0 : index
    %21 = vector.load %arg6[%c18, %c0_17] : memref<188x8xf32, #tpu.memory_space<vmem>>, vector<144x8xf32>
    %c19 = arith.constant 19 : index
    %c0_18 = arith.constant 0 : index
    %22 = vector.load %arg6[%c19, %c0_18] : memref<188x8xf32, #tpu.memory_space<vmem>>, vector<144x8xf32>
    %c20 = arith.constant 20 : index
    %c0_19 = arith.constant 0 : index
    %23 = vector.load %arg6[%c20, %c0_19] : memref<188x8xf32, #tpu.memory_space<vmem>>, vector<144x8xf32>
    %24 = tpu.concatenate %21, %22, %23 in 1 : vector<144x8xf32>, vector<144x8xf32>, vector<144x8xf32> -> vector<144x24xf32>
    %c1_20 = arith.constant 1 : index
    %c0_21 = arith.constant 0 : index
    %c0_22 = arith.constant 0 : index
    %25 = vector.load %arg4[%c1_20, %c0_21, %c0_22] : memref<3x24x8xf32, #tpu.memory_space<vmem>>, vector<1x24x8xf32>
    %26 = vector.shape_cast %25 : vector<1x24x8xf32> to vector<24x8xf32>
    %cst_23 = arith.constant dense<0.000000e+00> : vector<144x8xf32>
    %27 = tpu.matmul %24, %26, %cst_23 {dimension_numbers = #tpu.dot_dimension_numbers<[1], [0], [0], [1], [0, 0, 1, 1], [], []>} : vector<144x24xf32>, vector<24x8xf32>, vector<144x8xf32> -> vector<144x8xf32>
    %28 = arith.addf %20, %27 : vector<144x8xf32>
    %c36 = arith.constant 36 : index
    %c0_24 = arith.constant 0 : index
    %29 = vector.load %arg6[%c36, %c0_24] : memref<188x8xf32, #tpu.memory_space<vmem>>, vector<144x8xf32>
    %c37 = arith.constant 37 : index
    %c0_25 = arith.constant 0 : index
    %30 = vector.load %arg6[%c37, %c0_25] : memref<188x8xf32, #tpu.memory_space<vmem>>, vector<144x8xf32>
    %c38 = arith.constant 38 : index
    %c0_26 = arith.constant 0 : index
    %31 = vector.load %arg6[%c38, %c0_26] : memref<188x8xf32, #tpu.memory_space<vmem>>, vector<144x8xf32>
    %32 = tpu.concatenate %29, %30, %31 in 1 : vector<144x8xf32>, vector<144x8xf32>, vector<144x8xf32> -> vector<144x24xf32>
    %c2_27 = arith.constant 2 : index
    %c0_28 = arith.constant 0 : index
    %c0_29 = arith.constant 0 : index
    %33 = vector.load %arg4[%c2_27, %c0_28, %c0_29] : memref<3x24x8xf32, #tpu.memory_space<vmem>>, vector<1x24x8xf32>
    %34 = vector.shape_cast %33 : vector<1x24x8xf32> to vector<24x8xf32>
    %cst_30 = arith.constant dense<0.000000e+00> : vector<144x8xf32>
    %35 = tpu.matmul %32, %34, %cst_30 {dimension_numbers = #tpu.dot_dimension_numbers<[1], [0], [0], [1], [0, 0, 1, 1], [], []>} : vector<144x24xf32>, vector<24x8xf32>, vector<144x8xf32> -> vector<144x8xf32>
    %36 = arith.addf %28, %35 : vector<144x8xf32>
    %cst_31 = arith.constant 0.000000e+00 : f32
    %37 = vector.broadcast %cst_31 : f32 to vector<144x8xf32>
    %38 = arith.maximumf %36, %37 : vector<144x8xf32>
    %39 = vector.extract_strided_slice %38 {offsets = [0, 0], sizes = [16, 8], strides = [1, 1]} : vector<144x8xf32> to vector<16x8xf32>
    %c0_32 = arith.constant 0 : index
    %c0_33 = arith.constant 0 : index
    %c0_34 = arith.constant 0 : index
    %40 = vector.load %arg5[%c0_32, %c0_33, %c0_34] : memref<1x128x8xf32, #tpu.memory_space<vmem>>, vector<1x16x8xf32>
    %41 = vector.shape_cast %40 : vector<1x16x8xf32> to vector<16x8xf32>
    %42 = vector.shape_cast %39 : vector<16x8xf32> to vector<1x16x8xf32>
    tpu.vector_store %arg5[%c0_32, %c0_33, %c0_34], %42 {strides = array<i32>} : memref<1x128x8xf32, #tpu.memory_space<vmem>>, vector<1x16x8xf32>,
    %43 = vector.extract_strided_slice %38 {offsets = [18, 0], sizes = [16, 8], strides = [1, 1]} : vector<144x8xf32> to vector<16x8xf32>
    %c0_35 = arith.constant 0 : index
    %c16 = arith.constant 16 : index
    %c0_36 = arith.constant 0 : index
    %44 = vector.load %arg5[%c0_35, %c16, %c0_36] : memref<1x128x8xf32, #tpu.memory_space<vmem>>, vector<1x16x8xf32>
    %45 = vector.shape_cast %44 : vector<1x16x8xf32> to vector<16x8xf32>
    %46 = vector.shape_cast %43 : vector<16x8xf32> to vector<1x16x8xf32>
    tpu.vector_store %arg5[%c0_35, %c16, %c0_36], %46 {strides = array<i32>} : memref<1x128x8xf32, #tpu.memory_space<vmem>>, vector<1x16x8xf32>,
    %47 = vector.extract_strided_slice %38 {offsets = [36, 0], sizes = [16, 8], strides = [1, 1]} : vector<144x8xf32> to vector<16x8xf32>
    %c0_37 = arith.constant 0 : index
    %c32 = arith.constant 32 : index
    %c0_38 = arith.constant 0 : index
    %48 = vector.load %arg5[%c0_37, %c32, %c0_38] : memref<1x128x8xf32, #tpu.memory_space<vmem>>, vector<1x16x8xf32>
    %49 = vector.shape_cast %48 : vector<1x16x8xf32> to vector<16x8xf32>
    %50 = vector.shape_cast %47 : vector<16x8xf32> to vector<1x16x8xf32>
    tpu.vector_store %arg5[%c0_37, %c32, %c0_38], %50 {strides = array<i32>} : memref<1x128x8xf32, #tpu.memory_space<vmem>>, vector<1x16x8xf32>,
    %51 = vector.extract_strided_slice %38 {offsets = [54, 0], sizes = [16, 8], strides = [1, 1]} : vector<144x8xf32> to vector<16x8xf32>
    %c0_39 = arith.constant 0 : index
    %c48 = arith.constant 48 : index
    %c0_40 = arith.constant 0 : index
    %52 = vector.load %arg5[%c0_39, %c48, %c0_40] : memref<1x128x8xf32, #tpu.memory_space<vmem>>, vector<1x16x8xf32>
    %53 = vector.shape_cast %52 : vector<1x16x8xf32> to vector<16x8xf32>
    %54 = vector.shape_cast %51 : vector<16x8xf32> to vector<1x16x8xf32>
    tpu.vector_store %arg5[%c0_39, %c48, %c0_40], %54 {strides = array<i32>} : memref<1x128x8xf32, #tpu.memory_space<vmem>>, vector<1x16x8xf32>,
    %55 = vector.extract_strided_slice %38 {offsets = [72, 0], sizes = [16, 8], strides = [1, 1]} : vector<144x8xf32> to vector<16x8xf32>
    %c0_41 = arith.constant 0 : index
    %c64 = arith.constant 64 : index
    %c0_42 = arith.constant 0 : index
    %56 = vector.load %arg5[%c0_41, %c64, %c0_42] : memref<1x128x8xf32, #tpu.memory_space<vmem>>, vector<1x16x8xf32>
    %57 = vector.shape_cast %56 : vector<1x16x8xf32> to vector<16x8xf32>
    %58 = vector.shape_cast %55 : vector<16x8xf32> to vector<1x16x8xf32>
    tpu.vector_store %arg5[%c0_41, %c64, %c0_42], %58 {strides = array<i32>} : memref<1x128x8xf32, #tpu.memory_space<vmem>>, vector<1x16x8xf32>,
    %59 = vector.extract_strided_slice %38 {offsets = [90, 0], sizes = [16, 8], strides = [1, 1]} : vector<144x8xf32> to vector<16x8xf32>
    %c0_43 = arith.constant 0 : index
    %c80 = arith.constant 80 : index
    %c0_44 = arith.constant 0 : index
    %60 = vector.load %arg5[%c0_43, %c80, %c0_44] : memref<1x128x8xf32, #tpu.memory_space<vmem>>, vector<1x16x8xf32>
    %61 = vector.shape_cast %60 : vector<1x16x8xf32> to vector<16x8xf32>
    %62 = vector.shape_cast %59 : vector<16x8xf32> to vector<1x16x8xf32>
    tpu.vector_store %arg5[%c0_43, %c80, %c0_44], %62 {strides = array<i32>} : memref<1x128x8xf32, #tpu.memory_space<vmem>>, vector<1x16x8xf32>,
    %63 = vector.extract_strided_slice %38 {offsets = [108, 0], sizes = [16, 8], strides = [1, 1]} : vector<144x8xf32> to vector<16x8xf32>
    %c0_45 = arith.constant 0 : index
    %c96 = arith.constant 96 : index
    %c0_46 = arith.constant 0 : index
    %64 = vector.load %arg5[%c0_45, %c96, %c0_46] : memref<1x128x8xf32, #tpu.memory_space<vmem>>, vector<1x16x8xf32>
    %65 = vector.shape_cast %64 : vector<1x16x8xf32> to vector<16x8xf32>
    %66 = vector.shape_cast %63 : vector<16x8xf32> to vector<1x16x8xf32>
    tpu.vector_store %arg5[%c0_45, %c96, %c0_46], %66 {strides = array<i32>} : memref<1x128x8xf32, #tpu.memory_space<vmem>>, vector<1x16x8xf32>,
    %67 = vector.extract_strided_slice %38 {offsets = [126, 0], sizes = [16, 8], strides = [1, 1]} : vector<144x8xf32> to vector<16x8xf32>
    %c0_47 = arith.constant 0 : index
    %c112 = arith.constant 112 : index
    %c0_48 = arith.constant 0 : index
    %68 = vector.load %arg5[%c0_47, %c112, %c0_48] : memref<1x128x8xf32, #tpu.memory_space<vmem>>, vector<1x16x8xf32>
    %69 = vector.shape_cast %68 : vector<1x16x8xf32> to vector<16x8xf32>
    %70 = vector.shape_cast %67 : vector<16x8xf32> to vector<1x16x8xf32>
    tpu.vector_store %arg5[%c0_47, %c112, %c0_48], %70 {strides = array<i32>} : memref<1x128x8xf32, #tpu.memory_space<vmem>>, vector<1x16x8xf32>,
    return
  }
  func.func @transform_0(%arg0: i32, %arg1: i32) -> (i32, i32, i32) {
    %c0_i32 = arith.constant 0 : i32
    %c0_i32_0 = arith.constant 0 : i32
    %c0_i32_1 = arith.constant 0 : i32
    return %arg0, %c0_i32, %c0_i32_0 : i32, i32, i32
  }
  func.func @transform_1(%arg0: i32, %arg1: i32) -> (i32, i32) {
    %c0_i32 = arith.constant 0 : i32
    %c0_i32_0 = arith.constant 0 : i32
    %c0_i32_1 = arith.constant 0 : i32
    return %c0_i32, %c0_i32_0 : i32, i32
  }
  func.func @transform_2(%arg0: i32, %arg1: i32) -> (i32, i32, i32) {
    %c0_i32 = arith.constant 0 : i32
    %c0_i32_0 = arith.constant 0 : i32
    %c0_i32_1 = arith.constant 0 : i32
    %c0_i32_2 = arith.constant 0 : i32
    return %c0_i32, %c0_i32_0, %c0_i32_1 : i32, i32, i32
  }
  func.func @transform_3(%arg0: i32, %arg1: i32) -> (i32, i32, i32) {
    %c0_i32 = arith.constant 0 : i32
    %c0_i32_0 = arith.constant 0 : i32
    return %arg0, %arg1, %c0_i32 : i32, i32, i32
  }
}

</mosaic_0001>

<bundles_post_ra>
// kernel: tpu_custom_call.1
= control target key start
LH: loop header
LB: loop body
LE: loop exit
PB: predicated region body
PF: predicated region fallthrough
CT: control target
= control target key end

     0   :  { %s1853_s12 = smov 0   ;;  %s1855_s13 = smov 0   ;;  %s2530_s0 = inlined_call_operand.vmem [shape: f32[2,324,16], index: 0, kind: input, shape index: {}]   ;;  %s2531_s1 = inlined_call_operand.vmem [shape: f32[16,8], index: 1, kind: input, shape index: {}]   ;;  %s2532_s2 = inlined_call_operand.vmem [shape: f32[3,24,8], index: 2, kind: input, shape index: {}]   ;;  %s2533_s3 = inlined_call_operand.vmem [shape: f32[2,256,8], index: 3, kind: output, shape index: {}]  }
   0x1   :  { %s1857_s14 = smov 0   ;;  %s1859_s15 = smov 0  }
   0x2   :  { %s1861_s16 = smov 0  }
   0x3 LB: > { %s22_s17 = sadd.s32 1, %s1820_s14  ;;  %s25_s18 = sadd.s32 1, %s1824_s15  ;;  %s1828_s16 = sphi %s1861_s16, %s13_s16   ;;  %s1824_s15 = sphi %s1859_s15, %s2537_s15   ;;  %s1820_s14 = sphi %s1857_s14, %s2536_s14   ;;  %s1816_s13 = sphi %s1855_s13, %s2535_s13   ;;  %s1812_s12 = sphi %s1853_s12, %s2534_s12  }
   0x4   : > { %p23_p0 = scmp.ge.s32.totalorder %s22_s17, 2  ;;  %p1652_p1 = scmp.ge.s32.totalorder %s1828_s16, 1 }
   0x5   : > { %p151_p2 = scmp.lt.s32.totalorder %s1828_s16, 5 }
   0x6   : > { %s2539_s17 = smov (%p23_p0, %s22_s17), 0  ;;  %s2541_s18 = smov (!%p23_p0, %s25_s18), %s1824_s15 }
   0x7   : > { %p152_p3 = pnand %p1652_p1, %p151_p2  ;;  %p27_p4 = scmp.ge.s32.totalorder %s2541_s18, 2 }
   0x8   : > { %p179_p5 = scmp.lt.s32.totalorder (!%p152_p3), %s1816_s13, 1  ;;  %s194_s23 = smul.u32 (!%p152_p3), 144, %s1812_s12 }
   0x9   : > { %s2543_s18 = smov (%p27_p4, %s2541_s18), 0  ;;  %155 = sbr.rel (%p152_p3) target bundleno = 711 (0x2c7), region = 32 }
   0xa   : > { %s1831_s29 = smov (!%p152_p3), 16   ;;  %s1832_s30 = smov (!%p152_p3), 8  }
   0xb   : > { %s1654_s4 = sshll.u32 (!%p152_p3), %s1812_s12, 4 }
   0xc   : > { %p187_p6 = scmp.lt.s32.totalorder (!%p152_p3), %s1654_s4, 31 }
   0xe   : > { %v220_v0 = vld [vmem:[%s2531_s1 + $0x8] sm:$0xff]  ;;  %v219_v1 = vld [vmem:[%s2531_s1] sm:$0xff]  ;;  %s2545_s13 = smov (!%p179_p5, %s1816_s13), 1  ;;  %vm221_vm0 = vcmask 130048   ;;  %vm400_vm1 = vcmask 64512   ;;  %v1830_v21 = vmov 0.0  }
   0xf   : > { %305 = vmatpush.msra.mxu0 %v220_v0  ;;  %1743 = vmatpush.msra.mxu2 %v220_v0  ;;  %s1746_s24 = smul.u32 328, %s2545_s13  ;;  %425 = vst.msk [vmem:[#allocation2 + $0xb4] sm:$0xff] %vm400_vm1, %v1830_v21  ;;  %vm423_vm2 = vcmask 60416   ;;  %vm885_vm3 = vcmask 195584   ;;  %s2547_s4 = smov (!%p187_p6, %s1654_s4), 31  ;;  %vm1537_vm4 = vcmask 64514  }
  0x10   : > { %1742 = vmatpush.msra.mxu1 %v220_v0  ;;  %s1655_s12 = sshll.u32 %s2545_s13, 5  ;;  %vm1540_vm5 = vcmask 58368   ;;  %vm1542_vm6 = vcmask 64516   ;;  %vm1546_vm7 = vcmask 64518   ;;  %vm1549_vm8 = vcmask 62464  }
  0x11   : > { %306 = vmatpush.msra.mxu0 %v219_v1  ;;  %1745 = vmatpush.msra.mxu2 %v219_v1  ;;  %s183_s27 = scalar_lea.vmem %s2530_s0, %s1746_s24  ;;  %s190_s13 = sadd.s32 %s1655_s12, %s2547_s4 }
  0x12   : > { %1744 = vmatpush.msra.mxu1 %v219_v1  ;;  %s1898_s28 = scalar_lea.vmem %s183_s27, %s194_s23  ;;  %s1656_s5 = sshll.u32 %s190_s13, 3 }
  0x13   : > { %v196_v2 = vld [vmem:[%s1898_s28] sm:$0xff]  ;;  %v217_v3 = vld [vmem:[%s1898_s28 + $0xa8] sm:$0xff]  ;;  %v218_v6 = vld [vmem:[%s1898_s28 + $0xb0] sm:$0xf]  ;;  %s2366_s7 = scalar_lea.vmem %s2533_s3, %s1656_s5 }
  0x14   : > { %v216_v4 = vld [vmem:[%s1898_s28 + $0xa0] sm:$0xff]  ;;  %1657 = vmatmul.msk.f32.vlgmr.msra.gmra.mxu0 %vm221_vm0, %v196_v2  ;;  %1678 = vmatmul.msk.f32.vlgmr.msra.gmra.mxu2 %vm221_vm0, %v217_v3  ;;  %v197_v5 = vld [vmem:[%s1898_s28 + $0x8] sm:$0xff]  ;;  %v198_v7 = vld [vmem:[%s1898_s28 + $0x10] sm:$0xff] }
  0x15   : > { %1677 = vmatmul.msk.f32.vlgmr.msra.gmra.mxu1 %vm221_vm0, %v216_v4  ;;  %v199_v8 = vld [vmem:[%s1898_s28 + $0x18] sm:$0xff]  ;;  %v200_v9 = vld [vmem:[%s1898_s28 + $0x20] sm:$0xff]  ;;  %v201_v10 = vld [vmem:[%s1898_s28 + $0x28] sm:$0xff] }
  0x16   : > { %v202_v11 = vld [vmem:[%s1898_s28 + $0x30] sm:$0xff]  ;;  %v203_v12 = vld [vmem:[%s1898_s28 + $0x38] sm:$0xff]  ;;  %v204_v13 = vld [vmem:[%s1898_s28 + $0x40] sm:$0xff] }
  0x17   : > { %v205_v14 = vld [vmem:[%s1898_s28 + $0x48] sm:$0xff]  ;;  %v206_v15 = vld [vmem:[%s1898_s28 + $0x50] sm:$0xff]  ;;  %v207_v16 = vld [vmem:[%s1898_s28 + $0x58] sm:$0xff] }
  0x18   : > { %v208_v17 = vld [vmem:[%s1898_s28 + $0x60] sm:$0xff]  ;;  %v209_v18 = vld [vmem:[%s1898_s28 + $0x68] sm:$0xff]  ;;  %v210_v19 = vld [vmem:[%s1898_s28 + $0x70] sm:$0xff] }
  0x19   : > { %v211_v20 = vld [vmem:[%s1898_s28 + $0x78] sm:$0xff]  ;;  %v212_v23 = vld [vmem:[%s1898_s28 + $0x80] sm:$0xff]  ;;  %v213_v30 = vld [vmem:[%s1898_s28 + $0x88] sm:$0xff] }
  0x1a   : > { %v214_v37 = vld [vmem:[%s1898_s28 + $0x90] sm:$0xff]  ;;  %v215_v42 = vld [vmem:[%s1898_s28 + $0x98] sm:$0xff] }
  0x1c   : > { %1658 = vmatmul.msk.f32.gmra.mxu0 %vm221_vm0, %v197_v5  ;;  %1679 = vmatmul.msk.f32.gmra.mxu2 %vm221_vm0, %v218_v6 }
  0x24   : > { %1659 = vmatmul.msk.f32.gmra.mxu0 %vm221_vm0, %v198_v7 }
  0x2c   : > { %1660 = vmatmul.msk.f32.gmra.mxu0 %vm221_vm0, %v199_v8 }
  0x34   : > { %1661 = vmatmul.msk.f32.gmra.mxu0 %vm221_vm0, %v200_v9 }
  0x3c   : > { %1662 = vmatmul.msk.f32.gmra.mxu0 %vm221_vm0, %v201_v10 }
  0x44   : > { %1663 = vmatmul.msk.f32.gmra.mxu0 %vm221_vm0, %v202_v11 }
  0x4c   : > { %1664 = vmatmul.msk.f32.gmra.mxu0 %vm221_vm0, %v203_v12 }
  0x54   : > { %1665 = vmatmul.msk.f32.gmra.mxu0 %vm221_vm0, %v204_v13 }
  0x5c   : > { %1666 = vmatmul.msk.f32.gmra.mxu0 %vm221_vm0, %v205_v14 }
  0x64   : > { %1667 = vmatmul.msk.f32.gmra.mxu0 %vm221_vm0, %v206_v15 }
  0x6c   : > { %1668 = vmatmul.msk.f32.gmra.mxu0 %vm221_vm0, %v207_v16 }
  0x74   : > { %1669 = vmatmul.msk.f32.gmra.mxu0 %vm221_vm0, %v208_v17 }
  0x7c   : > { %1670 = vmatmul.msk.f32.gmra.mxu0 %vm221_vm0, %v209_v18 }
  0x84   : > { %1671 = vmatmul.msk.f32.gmra.mxu0 %vm221_vm0, %v210_v19 }
  0x8c   : > { %1672 = vmatmul.msk.f32.gmra.mxu0 %vm221_vm0, %v211_v20 }
  0x91   : > { %v308_v22 = vpop.f32.mrf.mxu0 }
  0x92   : > { %v377_v24 = vmax.f32 %v308_v22, 0.0  ;;  %v368_v25 = vpop.f32.mrf.mxu1 }
  0x93   : > { %v397_v26 = vmax.f32 %v368_v25, 0.0 }
  0x94   : > { %401 = vst.msk [vmem:[#allocation2] sm:$0xff] %vm400_vm1, %v377_v24  ;;  %1673 = vmatmul.msk.f32.gmra.mxu0 %vm221_vm0, %v212_v23 }
  0x95   : > { %421 = vst.msk [vmem:[#allocation2 + $0xa0] sm:$0xff] %vm400_vm1, %v397_v26 }
  0x97   : > { %v371_v27 = vpop.f32.mrf.mxu2 }
  0x98   : > { %v398_v28 = vmax.f32 %v371_v27, 0.0 }
  0x99   : > { %v311_v29 = vpop.f32.mrf.mxu0 }
  0x9a   : > { %422 = vst.msk [vmem:[#allocation2 + $0xa8] sm:$0xff] %vm400_vm1, %v398_v28  ;;  %v378_v31 = vmax.f32 %v311_v29, 0.0  ;;  %v662_v29 = vld [vmem:[%s2532_s2 + $0x10] sm:$0xff] }
  0x9b   : > { %1078 = vmatpush.msrb.mxu2 %v662_v29 }
  0x9c   : > { %402 = vst.msk [vmem:[#allocation2 + $0x8] sm:$0xff] %vm400_vm1, %v378_v31  ;;  %1674 = vmatmul.msk.f32.gmra.mxu0 %vm221_vm0, %v213_v30 }
  0x9f   : > { %v374_v32 = vpop.f32.mrf.mxu2 }
  0xa0   : > { %v399_v33 = vmax.f32 %v374_v32, 0.0  ;;  %v661_v32 = vld [vmem:[%s2532_s2 + $0x8] sm:$0xff] }
  0xa1   : > { %v314_v34 = vpop.f32.mrf.mxu0  ;;  %v1188_v35 = vld [vmem:[#allocation2 + $0xa6] sm:$0xff]  ;;  %1079 = vmatpush.msrb.mxu2 %v661_v32 }
  0xa2   : > { %v1170_v36 = vld [vmem:[#allocation2 + $0xa5] sm:$0xff]  ;;  %v379_v38 = vmax.f32 %v314_v34, 0.0  ;;  %1312 = vrot.lane.b32.xlu0 %v1188_v35, %s1831_s29  ;;  %424 = vst.msk [vmem:[#allocation2 + $0xb0] sm:$0xf] %vm423_vm2, %v399_v33 }
  0xa3   : > { %1240 = vrot.lane.b32.xlu2 %v1170_v36, %s1832_s30  ;;  %v462_v40 = vld [vmem:[#allocation2 + $0x2] sm:$0xff] }
  0xa4   : > { %403 = vst.msk [vmem:[#allocation2 + $0x10] sm:$0xff] %vm400_vm1, %v379_v38  ;;  %1675 = vmatmul.msk.f32.gmra.mxu0 %vm221_vm0, %v214_v37  ;;  %v444_v41 = vld [vmem:[#allocation2 + $0x1] sm:$0xff] }
  0xa5   : > { %v660_v33 = vld [vmem:[%s2532_s2] sm:$0xff] }
  0xa6   : > { %1080 = vmatpush.msrb.mxu2 %v660_v33 }
  0xa9   : > { %v317_v39 = vpop.f32.mrf.mxu0 }
  0xaa   : > { %v380_v43 = vmax.f32 %v317_v39, 0.0  ;;  %498 = vrot.lane.b32.xlu0 %v444_v41, %s1832_s30 }
  0xab   : > { %570 = vrot.lane.b32.xlu2 %v462_v40, %s1831_s29  ;;  %v445_v45 = vld [vmem:[#allocation2 + $0x9] sm:$0xff] }
  0xac   : > { %404 = vst.msk [vmem:[#allocation2 + $0x18] sm:$0xff] %vm400_vm1, %v380_v43  ;;  %1676 = vmatmul.msk.f32.gmra.mxu0 %vm221_vm0, %v215_v42  ;;  %v463_v50 = vld [vmem:[#allocation2 + $0xa] sm:$0xff] }
  0xb1   : > { %v320_v44 = vpop.f32.mrf.mxu0 }
  0xb2   : > { %v381_v46 = vmax.f32 %v320_v44, 0.0  ;;  %500 = vrot.lane.b32.xlu0 %v445_v45, %s1832_s30  ;;  %v1682_v45 = vld [vmem:[%s2532_s2 + $0x28] sm:$0xff] }
  0xb3   : > { %v683_v47 = vld [vmem:[#allocation2 + $0x14] sm:$0xff]  ;;  %953 = vmatpush.msrb.mxu1 %v1682_v45 }
  0xb4   : > { %v446_v48 = vld [vmem:[#allocation2 + $0x11] sm:$0xff]  ;;  %405 = vst.msk [vmem:[#allocation2 + $0x20] sm:$0xff] %vm400_vm1, %v381_v46  ;;  %791 = vrot.lane.b32.xlu2 %v683_v47, %s1831_s29  ;;  %v1681_v46 = vld [vmem:[%s2532_s2 + $0x20] sm:$0xff] }
  0xb5   : > { %502 = vrot.lane.b32.xlu1 %v446_v48, %s1832_s30  ;;  %v1963_v52 = vld [vmem:[#allocation2 + $0x12] sm:$0xff]  ;;  %954 = vmatpush.msrb.mxu1 %v1681_v46 }
  0xb6   : > { %v665_v53 = vld [vmem:[#allocation2 + $0x13] sm:$0xff] }
  0xb7   : > { %v1680_v48 = vld [vmem:[%s2532_s2 + $0x18] sm:$0xff] }
  0xb8   : > { %955 = vmatpush.msrb.mxu1 %v1680_v48 }
  0xb9   : > { %v323_v49 = vpop.f32.mrf.mxu0 }
  0xba   : > { %v382_v51 = vmax.f32 %v323_v49, 0.0  ;;  %572 = vrot.lane.b32.xlu0 %v463_v50, %s1831_s29 }
  0xbb   : > { %v666_v55 = vld [vmem:[#allocation2 + $0x1b] sm:$0xff] }
  0xbc   : > { %406 = vst.msk [vmem:[#allocation2 + $0x28] sm:$0xff] %vm400_vm1, %v382_v51  ;;  %574 = vrot.lane.b32.xlu2 %v1963_v52, %s1831_s29  ;;  %v447_v57 = vld [vmem:[#allocation2 + $0x19] sm:$0xff] }
  0xbd   : > { %719 = vrot.lane.b32.xlu1 %v665_v53, %s1832_s30  ;;  %v684_v62 = vld [vmem:[#allocation2 + $0x1c] sm:$0xff] }
  0xbe   : > { %v1981_v4 = vld [vmem:[#allocation2 + $0x1a] sm:$0xff] }
  0xc1   : > { %v326_v54 = vpop.f32.mrf.mxu0 }
  0xc2   : > { %v383_v56 = vmax.f32 %v326_v54, 0.0  ;;  %721 = vrot.lane.b32.xlu0 %v666_v55, %s1832_s30  ;;  %v1152_v54 = vld [vmem:[#allocation2 + $0xa4] sm:$0xff] }
  0xc3   : > { %v1154_v58 = vld [vmem:[#allocation2 + $0x25] sm:$0xff] }
  0xc4   : > { %407 = vst.msk [vmem:[#allocation2 + $0x30] sm:$0xff] %vm400_vm1, %v383_v56  ;;  %1208 = vrot.lane.b32.xlu2 %v1154_v58, %s1832_s30  ;;  %v1172_v60 = vld [vmem:[#allocation2 + $0x26] sm:$0xff] }
  0xc5   : > { %504 = vrot.lane.b32.xlu1 %v447_v57, %s1832_s30  ;;  %v667_v63 = vld [vmem:[#allocation2 + $0x23] sm:$0xff] }
  0xc6   : > { %v1977_v1 = vld [vmem:[#allocation2 + $0x24] sm:$0xff] }
  0xc7   : > { %v448_v6 = vld [vmem:[#allocation2 + $0x21] sm:$0xff] }
  0xc8   : > { %v1988_v8 = vld [vmem:[#allocation2 + $0x22] sm:$0xff] }
  0xc9   : > { %v329_v59 = vpop.f32.mrf.mxu0 }
  0xca   : > { %v384_v61 = vmax.f32 %v329_v59, 0.0  ;;  %1280 = vrot.lane.b32.xlu0 %v1172_v60, %s1831_s29 }
  0xcb   : > { %v1173_v2 = vld [vmem:[#allocation2 + $0x2e] sm:$0xff] }
  0xcc   : > { %408 = vst.msk [vmem:[#allocation2 + $0x38] sm:$0xff] %vm400_vm1, %v384_v61  ;;  %723 = vrot.lane.b32.xlu2 %v667_v63, %s1832_s30  ;;  %v1990_v9 = vld [vmem:[#allocation2 + $0x2c] sm:$0xff]  ;;  %v1721_v61 = vld [vmem:[%s2532_s2 + $0x40] sm:$0xff] }
  0xcd   : > { %793 = vrot.lane.b32.xlu1 %v684_v62, %s1831_s29  ;;  %v449_v11 = vld [vmem:[#allocation2 + $0x29] sm:$0xff]  ;;  %1441 = vmatpush.msra.mxu3 %v1721_v61 }
  0xce   : > { %v1155_v14 = vld [vmem:[#allocation2 + $0x2d] sm:$0xff] }
  0xcf   : > { %v668_v19 = vld [vmem:[#allocation2 + $0x2b] sm:$0xff] }
  0xd0   : > { %v2011_v24 = vld [vmem:[#allocation2 + $0x2a] sm:$0xff] }
  0xd1   : > { %v332_v0 = vpop.f32.mrf.mxu0 }
  0xd2   : > { %v385_v3 = vmax.f32 %v332_v0, 0.0  ;;  %795 = vrot.lane.b32.xlu0 %v1977_v1, %s1831_s29 }
  0xd3   : > { %v1997_v12 = vld [vmem:[#allocation2 + $0x34] sm:$0xff] }
  0xd4   : > { %409 = vst.msk [vmem:[#allocation2 + $0x40] sm:$0xff] %vm400_vm1, %v385_v3  ;;  %1282 = vrot.lane.b32.xlu2 %v1173_v2, %s1831_s29  ;;  %v1156_v16 = vld [vmem:[#allocation2 + $0x35] sm:$0xff] }
  0xd5   : > { %576 = vrot.lane.b32.xlu1 %v1981_v4, %s1831_s29  ;;  %v450_v21 = vld [vmem:[#allocation2 + $0x31] sm:$0xff] }
  0xd6   : > { %v1174_v30 = vld [vmem:[#allocation2 + $0x36] sm:$0xff] }
  0xd7   : > { %v669_v38 = vld [vmem:[#allocation2 + $0x33] sm:$0xff] }
  0xd8   : > { %v2039_v44 = vld [vmem:[#allocation2 + $0x32] sm:$0xff] }
  0xd9   : > { %v335_v5 = vpop.f32.mrf.mxu0  ;;  %v1720_v2 = vld [vmem:[%s2532_s2 + $0x38] sm:$0xff] }
  0xda   : > { %v386_v7 = vmax.f32 %v335_v5, 0.0  ;;  %506 = vrot.lane.b32.xlu0 %v448_v6, %s1832_s30  ;;  %1442 = vmatpush.msra.mxu3 %v1720_v2  ;;  %v426_v5 = vld [vmem:[#allocation2] sm:$0xff] }
  0xdb   : > { %v1157_v17 = vld [vmem:[#allocation2 + $0x3d] sm:$0xff] }
  0xdc   : > { %410 = vst.msk [vmem:[#allocation2 + $0x48] sm:$0xff] %vm400_vm1, %v386_v7  ;;  %797 = vrot.lane.b32.xlu2 %v1990_v9, %s1831_s29  ;;  %v2008_v22 = vld [vmem:[#allocation2 + $0x3c] sm:$0xff]  ;;  %v1719_v7 = vld [vmem:[%s2532_s2 + $0x30] sm:$0xff] }
  0xdd   : > { %578 = vrot.lane.b32.xlu1 %v1988_v8, %s1831_s29  ;;  %v1175_v25 = vld [vmem:[#allocation2 + $0x3e] sm:$0xff]  ;;  %1443 = vmatpush.msra.mxu3 %v1719_v7 }
  0xde   : > { %v451_v35 = vld [vmem:[#allocation2 + $0x39] sm:$0xff] }
  0xdf   : > { %v670_v55 = vld [vmem:[#allocation2 + $0x3b] sm:$0xff] }
  0xe0   : > { %v2076_v3 = vld [vmem:[#allocation2 + $0x3a] sm:$0xff] }
  0xe1   : > { %v338_v10 = vpop.f32.mrf.mxu0 }
  0xe2   : > { %v387_v13 = vmax.f32 %v338_v10, 0.0  ;;  %508 = vrot.lane.b32.xlu0 %v449_v11, %s1832_s30 }
  0xe3   : > { %v1158_v27 = vld [vmem:[#allocation2 + $0x45] sm:$0xff] }
  0xe4   : > { %411 = vst.msk [vmem:[#allocation2 + $0x50] sm:$0xff] %vm400_vm1, %v387_v13  ;;  %799 = vrot.lane.b32.xlu2 %v1997_v12, %s1831_s29  ;;  %v2031_v36 = vld [vmem:[#allocation2 + $0x44] sm:$0xff] }
  0xe5   : > { %1210 = vrot.lane.b32.xlu1 %v1155_v14, %s1832_s30  ;;  %v1176_v40 = vld [vmem:[#allocation2 + $0x46] sm:$0xff] }
  0xe6   : > { %v452_v50 = vld [vmem:[#allocation2 + $0x41] sm:$0xff] }
  0xe7   : > { %v2096_v29 = vld [vmem:[#allocation2 + $0x42] sm:$0xff] }
  0xe9   : > { %v341_v15 = vpop.f32.mrf.mxu0 }
  0xea   : > { %v388_v18 = vmax.f32 %v341_v15, 0.0  ;;  %1212 = vrot.lane.b32.xlu0 %v1156_v16, %s1832_s30 }
  0xeb   : > { %v1159_v42 = vld [vmem:[#allocation2 + $0x4d] sm:$0xff] }
  0xec   : > { %412 = vst.msk [vmem:[#allocation2 + $0x58] sm:$0xff] %vm400_vm1, %v388_v18  ;;  %1214 = vrot.lane.b32.xlu2 %v1157_v17, %s1832_s30  ;;  %v2056_v51 = vld [vmem:[#allocation2 + $0x4c] sm:$0xff]  ;;  %v671_v18 = vld [vmem:[#allocation2 + $0x43] sm:$0xff] }
  0xed   : > { %725 = vrot.lane.b32.xlu1 %v668_v19, %s1832_s30  ;;  %v1177_v60 = vld [vmem:[#allocation2 + $0x4e] sm:$0xff] }
  0xee   : > { %v453_v15 = vld [vmem:[#allocation2 + $0x49] sm:$0xff] }
  0xf1   : > { %v344_v20 = vpop.f32.mrf.mxu0 }
  0xf2   : > { %v389_v23 = vmax.f32 %v344_v20, 0.0  ;;  %510 = vrot.lane.b32.xlu0 %v450_v21, %s1832_s30 }
  0xf3   : > { %v1160_v63 = vld [vmem:[#allocation2 + $0x55] sm:$0xff] }
  0xf4   : > { %413 = vst.msk [vmem:[#allocation2 + $0x60] sm:$0xff] %vm400_vm1, %v389_v23  ;;  %801 = vrot.lane.b32.xlu2 %v2008_v22, %s1831_s29  ;;  %v2088_v16 = vld [vmem:[#allocation2 + $0x54] sm:$0xff] }
  0xf5   : > { %580 = vrot.lane.b32.xlu1 %v2011_v24, %s1831_s29  ;;  %v1178_v23 = vld [vmem:[#allocation2 + $0x56] sm:$0xff] }
  0xf6   : > { %v673_v61 = vld [vmem:[#allocation2 + $0x53] sm:$0xff] }
  0xf9   : > { %v347_v26 = vpop.f32.mrf.mxu0 }
  0xfa   : > { %v390_v28 = vmax.f32 %v347_v26, 0.0  ;;  %1286 = vrot.lane.b32.xlu0 %v1175_v25, %s1831_s29 }
  0xfb   : > { %v1161_v26 = vld [vmem:[#allocation2 + $0x5d] sm:$0xff] }
  0xfc   : > { %414 = vst.msk [vmem:[#allocation2 + $0x68] sm:$0xff] %vm400_vm1, %v390_v28  ;;  %1216 = vrot.lane.b32.xlu2 %v1158_v27, %s1832_s30  ;;  %v427_v28 = vld [vmem:[#allocation2 + $0x8] sm:$0xff] }
  0xfd   : > { %v1241_v31 = vpop.permute.xlu2 %1240  ;;  %1284 = vrot.lane.b32.xlu1 %v1174_v30, %s1831_s29 }
  0xfe   : > { %v1350_v56 = vsel %vm400_vm1, %v1152_v54, %v1241_v31 }
 0x101   : > { %v350_v34 = vpop.f32.mrf.mxu0 }
 0x102   : > { %v391_v37 = vmax.f32 %v350_v34, 0.0  ;;  %512 = vrot.lane.b32.xlu0 %v451_v35, %s1832_s30 }
 0x103   : > { %v1162_v48 = vld [vmem:[#allocation2 + $0x65] sm:$0xff] }
 0x104   : > { %415 = vst.msk [vmem:[#allocation2 + $0x70] sm:$0xff] %vm400_vm1, %v391_v37  ;;  %803 = vrot.lane.b32.xlu2 %v2031_v36, %s1831_s29 }
 0x105   : > { %727 = vrot.lane.b32.xlu1 %v669_v38, %s1832_s30  ;;  %v571_v39 = vpop.permute.xlu2 %570  ;;  %v428_v38 = vld [vmem:[#allocation2 + $0x10] sm:$0xff] }
 0x109   : > { %v353_v41 = vpop.f32.mrf.mxu0 }
 0x10a   : > { %v392_v43 = vmax.f32 %v353_v41, 0.0  ;;  %1288 = vrot.lane.b32.xlu0 %v1176_v40, %s1831_s29  ;;  %v2112_v40 = vld [vmem:[#allocation2 + $0x5c] sm:$0xff] }
 0x10c   : > { %416 = vst.msk [vmem:[#allocation2 + $0x78] sm:$0xff] %vm400_vm1, %v392_v43  ;;  %1218 = vrot.lane.b32.xlu2 %v1159_v42, %s1832_s30  ;;  %v672_v42 = vld [vmem:[#allocation2 + $0x4b] sm:$0xff] }
 0x10d   : > { %582 = vrot.lane.b32.xlu1 %v2039_v44, %s1831_s29 }
 0x10e   : > { %v2051_v47 = vpop.permute.xlu2 %791 }
 0x111   : > { %v356_v49 = vpop.f32.mrf.mxu0 }
 0x112   : > { %v393_v53 = vmax.f32 %v356_v49, 0.0  ;;  %514 = vrot.lane.b32.xlu0 %v452_v50, %s1832_s30  ;;  %v2125_v49 = vld [vmem:[#allocation2 + $0x4a] sm:$0xff] }
 0x114   : > { %417 = vst.msk [vmem:[#allocation2 + $0x80] sm:$0xff] %vm400_vm1, %v393_v53  ;;  %v1313_v57 = vpop.permute.xlu0 %1312  ;;  %805 = vrot.lane.b32.xlu2 %v2056_v51, %s1831_s29 }
 0x115   : > { %729 = vrot.lane.b32.xlu1 %v670_v55, %s1832_s30  ;;  %v2065_v58 = vsel %vm221_vm0, %v1350_v56, %v1313_v57 }
 0x116   : > { %v2067_v59 = vpop.permute.xlu2 %574 }
 0x119   : > { %v359_v62 = vpop.f32.mrf.mxu0 }
 0x11a   : > { %v394_v0 = vmax.f32 %v359_v62, 0.0  ;;  %1290 = vrot.lane.b32.xlu0 %v1177_v60, %s1831_s29  ;;  %v2140_v60 = vld [vmem:[#allocation2 + $0x64] sm:$0xff] }
 0x11c   : > { %418 = vst.msk [vmem:[#allocation2 + $0x88] sm:$0xff] %vm400_vm1, %v394_v0  ;;  %v499_v6 = vpop.permute.xlu0 %498  ;;  %1220 = vrot.lane.b32.xlu2 %v1160_v63, %s1832_s30 }
 0x11d   : > { %584 = vrot.lane.b32.xlu1 %v2076_v3, %s1831_s29  ;;  %v624_v10 = vsel %vm400_vm1, %v426_v5, %v499_v6 }
 0x11e   : > { %v1209_v11 = vpop.permute.xlu2 %1208  ;;  %v642_v13 = vsel %vm221_vm0, %v624_v10, %v571_v39  ;;  %v454_v39 = vld [vmem:[#allocation2 + $0x51] sm:$0xff]  ;;  %v1180_v10 = vld [vmem:[#allocation2 + $0x66] sm:$0xff] }
 0x11f   : > { %1701 = vmatmul.msk.f32.vlgmr.msrb.gmra.mxu2 %vm885_vm3, %v642_v13  ;;  %v1334_v50 = vsel %vm400_vm1, %v1977_v1, %v1209_v11  ;;  %v455_v1 = vld [vmem:[#allocation2 + $0x59] sm:$0xff]  ;;  %v1163_v11 = vld [vmem:[#allocation2 + $0x6d] sm:$0xff] }
 0x120   : > { %v2156_v13 = vld [vmem:[#allocation2 + $0x52] sm:$0xff] }
 0x121   : > { %v362_v14 = vpop.f32.mrf.mxu0 }
 0x122   : > { %v395_v17 = vmax.f32 %v362_v14, 0.0  ;;  %516 = vrot.lane.b32.xlu0 %v453_v15, %s1832_s30 }
 0x124   : > { %419 = vst.msk [vmem:[#allocation2 + $0x90] sm:$0xff] %vm400_vm1, %v395_v17  ;;  %v501_v19 = vpop.permute.xlu0 %500  ;;  %807 = vrot.lane.b32.xlu2 %v2088_v16, %s1831_s29 }
 0x125   : > { %731 = vrot.lane.b32.xlu1 %v671_v18, %s1832_s30  ;;  %v625_v30 = vsel %vm400_vm1, %v427_v28, %v501_v19 }
 0x126   : > { %v724_v21 = vpop.permute.xlu2 %723 }
 0x127   : > { %v503_v20 = vpop.permute.xlu1 %502  ;;  %v847_v63 = vsel %vm400_vm1, %v1988_v8, %v724_v21  ;;  %v430_v8 = vld [vmem:[#allocation2 + $0x20] sm:$0xff]  ;;  %v2166_v21 = vld [vmem:[#allocation2 + $0x6c] sm:$0xff] }
 0x128   : > { %v626_v41 = vsel %vm400_vm1, %v428_v38, %v503_v20  ;;  %v456_v20 = vld [vmem:[#allocation2 + $0x61] sm:$0xff] }
 0x129   : > { %v365_v25 = vpop.f32.mrf.mxu0 }
 0x12a   : > { %v396_v27 = vmax.f32 %v365_v25, 0.0  ;;  %1292 = vrot.lane.b32.xlu0 %v1178_v23, %s1831_s29  ;;  %v674_v23 = vld [vmem:[#allocation2 + $0x5b] sm:$0xff] }
 0x12c   : > { %420 = vst.msk [vmem:[#allocation2 + $0x98] sm:$0xff] %vm400_vm1, %v396_v27  ;;  %v573_v31 = vpop.permute.xlu0 %572  ;;  %1222 = vrot.lane.b32.xlu2 %v1161_v26, %s1832_s30 }
 0x12d   : > { %586 = vrot.lane.b32.xlu1 %v2096_v29, %s1831_s29  ;;  %v643_v32 = vsel %vm221_vm0, %v625_v30, %v573_v31  ;;  %v1181_v30 = vld [vmem:[#allocation2 + $0x6e] sm:$0xff] }
 0x12e   : > { %1702 = vmatmul.msk.f32.gmra.mxu2 %vm885_vm3, %v643_v32  ;;  %v2105_v34 = vpop.permute.xlu2 %1282  ;;  %v1164_v32 = vld [vmem:[#allocation2 + $0x75] sm:$0xff] }
 0x12f   : > { %v720_v33 = vpop.permute.xlu1 %719 }
 0x130   : > { %v845_v35 = vsel %vm400_vm1, %v1963_v52, %v720_v33  ;;  %v644_v52 = vsel %vm221_vm0, %v626_v41, %v2067_v59  ;;  %v2180_v33 = vld [vmem:[#allocation2 + $0x5a] sm:$0xff] }
 0x131   : > { %v863_v37 = vsel %vm221_vm0, %v845_v35, %v2051_v47  ;;  %v1179_v47 = vld [vmem:[#allocation2 + $0x5e] sm:$0xff]  ;;  %v2192_v41 = vld [vmem:[#allocation2 + $0x74] sm:$0xff] }
 0x132   : > { %1683 = vmatmul.msk.f32.vlgmr.msrb.gmra.mxu1 %vm885_vm3, %v863_v37  ;;  %518 = vrot.lane.b32.xlu0 %v454_v39, %s1832_s30  ;;  %v457_v39 = vld [vmem:[#allocation2 + $0x69] sm:$0xff] }
 0x134   : > { %v722_v43 = vpop.permute.xlu0 %721  ;;  %809 = vrot.lane.b32.xlu2 %v2112_v40, %s1831_s29 }
 0x135   : > { %733 = vrot.lane.b32.xlu1 %v672_v42, %s1832_s30  ;;  %v846_v55 = vsel %vm400_vm1, %v1981_v4, %v722_v43  ;;  %v429_v4 = vld [vmem:[#allocation2 + $0x18] sm:$0xff]  ;;  %v675_v42 = vld [vmem:[#allocation2 + $0x63] sm:$0xff] }
 0x136   : > { %1703 = vmatmul.msk.f32.gmra.mxu2 %vm885_vm3, %v644_v52  ;;  %v2122_v46 = vpop.permute.xlu2 %797  ;;  %v431_v52 = vld [vmem:[#allocation2 + $0x28] sm:$0xff] }
 0x137   : > { %v505_v45 = vpop.permute.xlu1 %504 }
 0x138   : > { %v627_v0 = vsel %vm400_vm1, %v429_v4, %v505_v45  ;;  %v676_v4 = vld [vmem:[#allocation2 + $0x6b] sm:$0xff] }
 0x13a   : > { %1294 = vrot.lane.b32.xlu0 %v1179_v47, %s1831_s29 }
 0x13c   : > { %v1281_v53 = vpop.permute.xlu0 %1280  ;;  %1224 = vrot.lane.b32.xlu2 %v1162_v48, %s1832_s30  ;;  %v1182_v48 = vld [vmem:[#allocation2 + $0x76] sm:$0xff] }
 0x13d   : > { %588 = vrot.lane.b32.xlu1 %v2125_v49, %s1831_s29  ;;  %v1352_v54 = vsel %vm221_vm0, %v1334_v50, %v1281_v53  ;;  %v1165_v50 = vld [vmem:[#allocation2 + $0x7d] sm:$0xff] }
 0x13e   : > { %1722 = vmatmul.msk.f32.vlgmr.msra.gmra.mxu3 %vm885_vm3, %v1352_v54  ;;  %v2136_v57 = vpop.permute.xlu2 %799  ;;  %v2204_v53 = vld [vmem:[#allocation2 + $0x62] sm:$0xff] }
 0x13f   : > { %v794_v56 = vpop.permute.xlu1 %793 }
 0x140   : > { %v864_v59 = vsel %vm221_vm0, %v846_v55, %v794_v56 }
 0x141   : > { %1684 = vmatmul.msk.f32.gmra.mxu1 %vm885_vm3, %v864_v59 }
 0x142   : > { %520 = vrot.lane.b32.xlu0 %v455_v1, %s1832_s30 }
 0x144   : > { %v796_v62 = vpop.permute.xlu0 %795  ;;  %811 = vrot.lane.b32.xlu2 %v2140_v60, %s1831_s29 }
 0x145   : > { %735 = vrot.lane.b32.xlu1 %v673_v61, %s1832_s30  ;;  %v865_v6 = vsel %vm221_vm0, %v847_v63, %v796_v62  ;;  %v458_v61 = vld [vmem:[#allocation2 + $0x71] sm:$0xff]  ;;  %v2215_v62 = vld [vmem:[#allocation2 + $0x7c] sm:$0xff] }
 0x146   : > { %v2149_v5 = vpop.permute.xlu2 %1214 }
 0x147   : > { %v577_v2 = vpop.permute.xlu1 %576 }
 0x148   : > { %v645_v7 = vsel %vm221_vm0, %v627_v0, %v577_v2 }
 0x149   : > { %1685 = vmatmul.msk.f32.gmra.mxu1 %vm885_vm3, %v865_v6  ;;  %1704 = vmatmul.msk.f32.gmra.mxu2 %vm885_vm3, %v645_v7 }
 0x14a   : > { %1296 = vrot.lane.b32.xlu0 %v1180_v10, %s1831_s29  ;;  %v1183_v10 = vld [vmem:[#allocation2 + $0x7e] sm:$0xff] }
 0x14c   : > { %v507_v14 = vpop.permute.xlu0 %506  ;;  %1226 = vrot.lane.b32.xlu2 %v1163_v11, %s1832_s30 }
 0x14d   : > { %590 = vrot.lane.b32.xlu1 %v2156_v13, %s1831_s29  ;;  %v628_v15 = vsel %vm400_vm1, %v430_v8, %v507_v14  ;;  %v1166_v8 = vld [vmem:[#allocation2 + $0x85] sm:$0xff] }
 0x14e   : > { %v2162_v18 = vpop.permute.xlu2 %801 }
 0x14f   : > { %v579_v17 = vpop.permute.xlu1 %578 }
 0x150   : > { %v646_v19 = vsel %vm221_vm0, %v628_v15, %v579_v17 }
 0x151   : > { %1705 = vmatmul.msk.f32.gmra.mxu2 %vm885_vm3, %v646_v19 }
 0x152   : > { %522 = vrot.lane.b32.xlu0 %v456_v20, %s1832_s30 }
 0x154   : > { %v509_v25 = vpop.permute.xlu0 %508  ;;  %813 = vrot.lane.b32.xlu2 %v2166_v21, %s1831_s29 }
 0x155   : > { %737 = vrot.lane.b32.xlu1 %v674_v23, %s1832_s30  ;;  %v459_v23 = vld [vmem:[#allocation2 + $0x79] sm:$0xff] }
 0x156   : > { %v2172_v27 = vpop.permute.xlu2 %1216 }
 0x157   : > { %v1211_v26 = vpop.permute.xlu1 %1210  ;;  %v1338_v14 = vsel %vm400_vm1, %v2031_v36, %v2172_v27 }
 0x158   : > { %v1335_v28 = vsel %vm400_vm1, %v1990_v9, %v1211_v26  ;;  %v677_v26 = vld [vmem:[#allocation2 + $0x73] sm:$0xff] }
 0x159   : > { %v1353_v31 = vsel %vm221_vm0, %v1335_v28, %v2105_v34 }
 0x15a   : > { %1723 = vmatmul.msk.f32.gmra.mxu3 %vm885_vm3, %v1353_v31  ;;  %1298 = vrot.lane.b32.xlu0 %v1181_v30, %s1831_s29  ;;  %v1184_v31 = vld [vmem:[#allocation2 + $0x86] sm:$0xff] }
 0x15c   : > { %v1213_v35 = vpop.permute.xlu0 %1212  ;;  %1228 = vrot.lane.b32.xlu2 %v1164_v32, %s1832_s30 }
 0x15d   : > { %592 = vrot.lane.b32.xlu1 %v2180_v33, %s1831_s29  ;;  %v1336_v55 = vsel %vm400_vm1, %v1997_v12, %v1213_v35  ;;  %v1337_v12 = vsel %vm400_vm1, %v2008_v22, %v2149_v5  ;;  %v2234_v22 = vld [vmem:[#allocation2 + $0x6a] sm:$0xff] }
 0x15e   : > { %v2185_v38 = vpop.permute.xlu2 %803  ;;  %v1167_v35 = vld [vmem:[#allocation2 + $0x8d] sm:$0xff] }
 0x15f   : > { %v726_v37 = vpop.permute.xlu1 %725 }
 0x160   : > { %v848_v9 = vsel %vm400_vm1, %v2011_v24, %v726_v37  ;;  %v629_v24 = vsel %vm400_vm1, %v431_v52, %v509_v25  ;;  %v2249_v25 = vld [vmem:[#allocation2 + $0x84] sm:$0xff]  ;;  %v2263_v37 = vld [vmem:[#allocation2 + $0x72] sm:$0xff] }
 0x161   : > { %v866_v34 = vsel %vm221_vm0, %v848_v9, %v2122_v46 }
 0x162   : > { %1686 = vmatmul.msk.f32.gmra.mxu1 %vm885_vm3, %v866_v34  ;;  %524 = vrot.lane.b32.xlu0 %v457_v39, %s1832_s30 }
 0x164   : > { %v511_v43 = vpop.permute.xlu0 %510  ;;  %815 = vrot.lane.b32.xlu2 %v2192_v41, %s1831_s29 }
 0x165   : > { %739 = vrot.lane.b32.xlu1 %v675_v42, %s1832_s30 }
 0x166   : > { %v2199_v47 = vpop.permute.xlu2 %1218 }
 0x167   : > { %v581_v45 = vpop.permute.xlu1 %580  ;;  %v1339_v9 = vsel %vm400_vm1, %v2056_v51, %v2199_v47  ;;  %v460_v51 = vld [vmem:[#allocation2 + $0x81] sm:$0xff] }
 0x168   : > { %v647_v46 = vsel %vm221_vm0, %v629_v24, %v581_v45  ;;  %v2278_v24 = vld [vmem:[#allocation2 + $0x8c] sm:$0xff]  ;;  %v678_v45 = vld [vmem:[#allocation2 + $0x7b] sm:$0xff] }
 0x169   : > { %1706 = vmatmul.msk.f32.gmra.mxu2 %vm885_vm3, %v647_v46 }
 0x16a   : > { %1300 = vrot.lane.b32.xlu0 %v1182_v48, %s1831_s29 }
 0x16c   : > { %v1287_v54 = vpop.permute.xlu0 %1286  ;;  %1230 = vrot.lane.b32.xlu2 %v1165_v50, %s1832_s30 }
 0x16d   : > { %594 = vrot.lane.b32.xlu1 %v2204_v53, %s1831_s29  ;;  %v1355_v7 = vsel %vm221_vm0, %v1337_v12, %v1287_v54  ;;  %v1185_v54 = vld [vmem:[#allocation2 + $0x8e] sm:$0xff] }
 0x16e   : > { %v2211_v59 = vpop.permute.xlu2 %805 }
 0x16f   : > { %v1285_v56 = vpop.permute.xlu1 %1284 }
 0x170   : > { %v1354_v1 = vsel %vm221_vm0, %v1336_v55, %v1285_v56  ;;  %v1168_v56 = vld [vmem:[#allocation2 + $0x95] sm:$0xff] }
 0x171   : > { %1724 = vmatmul.msk.f32.gmra.mxu3 %vm885_vm3, %v1354_v1  ;;  %v2292_v1 = vld [vmem:[#allocation2 + $0x7a] sm:$0xff] }
 0x172   : > { %526 = vrot.lane.b32.xlu0 %v458_v61, %s1832_s30 }
 0x174   : > { %v513_v63 = vpop.permute.xlu0 %512  ;;  %817 = vrot.lane.b32.xlu2 %v2215_v62, %s1831_s29 }
 0x175   : > { %741 = vrot.lane.b32.xlu1 %v676_v4, %s1832_s30 }
 0x176   : > { %v2224_v2 = vpop.permute.xlu2 %1220 }
 0x177   : > { %v728_v0 = vpop.permute.xlu1 %727  ;;  %v1340_v61 = vsel %vm400_vm1, %v2088_v16, %v2224_v2  ;;  %v679_v2 = vld [vmem:[#allocation2 + $0x83] sm:$0xff] }
 0x178   : > { %v849_v6 = vsel %vm400_vm1, %v2039_v44, %v728_v0  ;;  %v432_v44 = vld [vmem:[#allocation2 + $0x30] sm:$0xff] }
 0x179   : > { %1725 = vmatmul.msk.f32.gmra.mxu3 %vm885_vm3, %v1355_v7  ;;  %v867_v11 = vsel %vm221_vm0, %v849_v6, %v2136_v57  ;;  %v630_v57 = vsel %vm400_vm1, %v432_v44, %v511_v43  ;;  %v1186_v6 = vld [vmem:[#allocation2 + $0x96] sm:$0xff]  ;;  %v1187_v44 = vld [vmem:[#allocation2 + $0x9e] sm:$0xff] }
 0x17a   : > { %1687 = vmatmul.msk.f32.gmra.mxu1 %vm885_vm3, %v867_v11  ;;  %1302 = vrot.lane.b32.xlu0 %v1183_v10, %s1831_s29  ;;  %v1169_v7 = vld [vmem:[#allocation2 + $0x9d] sm:$0xff] }
 0x17c   : > { %v1289_v5 = vpop.permute.xlu0 %1288  ;;  %1232 = vrot.lane.b32.xlu2 %v1166_v8, %s1832_s30 }
 0x17d   : > { %596 = vrot.lane.b32.xlu1 %v2234_v22, %s1831_s29  ;;  %v1356_v20 = vsel %vm221_vm0, %v1338_v14, %v1289_v5 }
 0x17e   : > { %v2243_v17 = vpop.permute.xlu2 %807 }
 0x17f   : > { %v583_v15 = vpop.permute.xlu1 %582 }
 0x180   : > { %v648_v19 = vsel %vm221_vm0, %v630_v57, %v583_v15  ;;  %v2318_v57 = vld [vmem:[#allocation2 + $0x82] sm:$0xff]  ;;  %v1171_v15 = vld [vmem:[#allocation2 + $0xad] sm:$0xff] }
 0x181   : > { %1707 = vmatmul.msk.f32.gmra.mxu2 %vm885_vm3, %v648_v19  ;;  %1726 = vmatmul.msk.f32.gmra.mxu3 %vm885_vm3, %v1356_v20 }
 0x182   : > { %528 = vrot.lane.b32.xlu0 %v459_v23, %s1832_s30 }
 0x184   : > { %v515_v36 = vpop.permute.xlu0 %514  ;;  %819 = vrot.lane.b32.xlu2 %v2249_v25, %s1831_s29 }
 0x185   : > { %743 = vrot.lane.b32.xlu1 %v677_v26, %s1832_s30 }
 0x186   : > { %v2255_v28 = vpop.permute.xlu2 %1222 }
 0x187   : > { %v730_v27 = vpop.permute.xlu1 %729  ;;  %v1341_v19 = vsel %vm400_vm1, %v2112_v40, %v2255_v28  ;;  %v680_v40 = vld [vmem:[#allocation2 + $0x8b] sm:$0xff]  ;;  %v2333_v28 = vld [vmem:[#allocation2 + $0x94] sm:$0xff] }
 0x188   : > { %v850_v30 = vsel %vm400_vm1, %v2076_v3, %v730_v27  ;;  %v433_v3 = vld [vmem:[#allocation2 + $0x38] sm:$0xff]  ;;  %v461_v27 = vld [vmem:[#allocation2 + $0x89] sm:$0xff] }
 0x189   : > { %v868_v32 = vsel %vm221_vm0, %v850_v30, %v2162_v18  ;;  %v631_v39 = vsel %vm400_vm1, %v433_v3, %v513_v63  ;;  %v2347_v3 = vld [vmem:[#allocation2 + $0x8a] sm:$0xff] }
 0x18a   : > { %1688 = vmatmul.msk.f32.gmra.mxu1 %vm885_vm3, %v868_v32  ;;  %1304 = vrot.lane.b32.xlu0 %v1184_v31, %s1831_s29 }
 0x18c   : > { %v1291_v34 = vpop.permute.xlu0 %1290  ;;  %1234 = vrot.lane.b32.xlu2 %v1167_v35, %s1832_s30 }
 0x18d   : > { %598 = vrot.lane.b32.xlu1 %v2263_v37, %s1831_s29  ;;  %v1357_v18 = vsel %vm221_vm0, %v1339_v9, %v1291_v34  ;;  %v1189_v34 = vld [vmem:[#allocation2 + $0xae] sm:$0xff] }
 0x18e   : > { %1727 = vmatmul.msk.f32.gmra.mxu3 %vm885_vm3, %v1357_v18  ;;  %v2274_v43 = vpop.permute.xlu2 %809  ;;  %v2349_v18 = vld [vmem:[#allocation2 + $0x9c] sm:$0xff] }
 0x18f   : > { %v585_v42 = vpop.permute.xlu1 %584 }
 0x190   : > { %v649_v52 = vsel %vm221_vm0, %v631_v39, %v585_v42 }
 0x191   : > { %1708 = vmatmul.msk.f32.gmra.mxu2 %vm885_vm3, %v649_v52 }
 0x192   : > { %530 = vrot.lane.b32.xlu0 %v460_v51, %s1832_s30 }
 0x194   : > { %v517_v47 = vpop.permute.xlu0 %516  ;;  %821 = vrot.lane.b32.xlu2 %v2278_v24, %s1831_s29 }
 0x195   : > { %745 = vrot.lane.b32.xlu1 %v678_v45, %s1832_s30 }
 0x196   : > { %v2286_v50 = vpop.permute.xlu2 %1224 }
 0x197   : > { %v732_v46 = vpop.permute.xlu1 %731  ;;  %v1342_v39 = vsel %vm400_vm1, %v2140_v60, %v2286_v50 }
 0x198   : > { %v851_v48 = vsel %vm400_vm1, %v2096_v29, %v732_v46  ;;  %v434_v29 = vld [vmem:[#allocation2 + $0x40] sm:$0xff] }
 0x199   : > { %v869_v55 = vsel %vm221_vm0, %v851_v48, %v2185_v38  ;;  %v632_v63 = vsel %vm400_vm1, %v434_v29, %v515_v36 }
 0x19a   : > { %1689 = vmatmul.msk.f32.gmra.mxu1 %vm885_vm3, %v869_v55  ;;  %1306 = vrot.lane.b32.xlu0 %v1185_v54, %s1831_s29  ;;  %v681_v55 = vld [vmem:[#allocation2 + $0x93] sm:$0xff] }
 0x19c   : > { %v1293_v4 = vpop.permute.xlu0 %1292  ;;  %1236 = vrot.lane.b32.xlu2 %v1168_v56, %s1832_s30 }
 0x19d   : > { %600 = vrot.lane.b32.xlu1 %v2292_v1, %s1831_s29  ;;  %v1358_v38 = vsel %vm221_vm0, %v1340_v61, %v1293_v4 }
 0x19e   : > { %1728 = vmatmul.msk.f32.gmra.mxu3 %vm885_vm3, %v1358_v38  ;;  %v2305_v16 = vpop.permute.xlu2 %811 }
 0x19f   : > { %v587_v12 = vpop.permute.xlu1 %586 }
 0x1a0   : > { %v650_v0 = vsel %vm221_vm0, %v632_v63, %v587_v12  ;;  %v682_v12 = vld [vmem:[#allocation2 + $0x9b] sm:$0xff] }
 0x1a1   : > { %1709 = vmatmul.msk.f32.gmra.mxu2 %vm885_vm3, %v650_v0 }
 0x1a2   : > { %1308 = vrot.lane.b32.xlu0 %v1186_v6, %s1831_s29 }
 0x1a4   : > { %v519_v10 = vpop.permute.xlu0 %518  ;;  %1238 = vrot.lane.b32.xlu2 %v1169_v7, %s1832_s30 }
 0x1a5   : > { %747 = vrot.lane.b32.xlu1 %v679_v2, %s1832_s30  ;;  %v437_v2 = vld [vmem:[#allocation2 + $0x58] sm:$0xff] }
 0x1a6   : > { %v2316_v14 = vpop.permute.xlu2 %1226 }
 0x1a7   : > { %v734_v11 = vpop.permute.xlu1 %733  ;;  %v1343_v0 = vsel %vm400_vm1, %v2166_v21, %v2316_v14 }
 0x1a8   : > { %v852_v8 = vsel %vm400_vm1, %v2125_v49, %v734_v11  ;;  %v435_v49 = vld [vmem:[#allocation2 + $0x48] sm:$0xff] }
 0x1a9   : > { %v870_v5 = vsel %vm221_vm0, %v852_v8, %v2211_v59  ;;  %v633_v23 = vsel %vm400_vm1, %v435_v49, %v517_v47  ;;  %v1082_v47 = vpop.f32.mrf.mxu2 }
 0x1aa   : > { %1690 = vmatmul.msk.f32.gmra.mxu1 %vm885_vm3, %v870_v5  ;;  %1310 = vrot.lane.b32.xlu0 %v1187_v44, %s1831_s29 }
 0x1ac   : > { %v1295_v20 = vpop.permute.xlu0 %1294  ;;  %1242 = vrot.lane.b32.xlu2 %v1171_v15, %s1832_s30 }
 0x1ad   : > { %602 = vrot.lane.b32.xlu1 %v2318_v57, %s1831_s29  ;;  %v1359_v59 = vsel %vm221_vm0, %v1341_v19, %v1295_v20 }
 0x1ae   : > { %1729 = vmatmul.msk.f32.gmra.mxu3 %vm885_vm3, %v1359_v59  ;;  %v2338_v31 = vpop.permute.xlu2 %813 }
 0x1af   : > { %v589_v26 = vpop.permute.xlu1 %588 }
 0x1b0   : > { %v651_v36 = vsel %vm221_vm0, %v633_v23, %v589_v26  ;;  %v438_v23 = vld [vmem:[#allocation2 + $0x60] sm:$0xff] }
 0x1b1   : > { %1710 = vmatmul.msk.f32.gmra.mxu2 %vm885_vm3, %v651_v36  ;;  %v1085_v15 = vpop.f32.mrf.mxu2 }
 0x1b2   : > { %532 = vrot.lane.b32.xlu0 %v461_v27, %s1832_s30 }
 0x1b4   : > { %v521_v30 = vpop.permute.xlu0 %520  ;;  %823 = vrot.lane.b32.xlu2 %v2333_v28, %s1831_s29 }
 0x1b5   : > { %749 = vrot.lane.b32.xlu1 %v680_v40, %s1832_s30 }
 0x1b6   : > { %v1229_v46 = vpop.permute.xlu2 %1228 }
 0x1b7   : > { %v736_v32 = vpop.permute.xlu1 %735  ;;  %v1344_v20 = vsel %vm400_vm1, %v2192_v41, %v1229_v46 }
 0x1b8   : > { %v853_v35 = vsel %vm400_vm1, %v2156_v13, %v736_v32  ;;  %v436_v13 = vld [vmem:[#allocation2 + $0x50] sm:$0xff] }
 0x1b9   : > { %v871_v9 = vsel %vm221_vm0, %v853_v35, %v2243_v17  ;;  %v957_v17 = vpop.f32.mrf.mxu1  ;;  %v634_v51 = vsel %vm400_vm1, %v436_v13, %v519_v10  ;;  %v439_v13 = vld [vmem:[#allocation2 + $0x68] sm:$0xff] }
 0x1ba   : > { %1691 = vmatmul.msk.f32.gmra.mxu1 %vm885_vm3, %v871_v9  ;;  %1314 = vrot.lane.b32.xlu0 %v1189_v34, %s1831_s29  ;;  %v1083_v48 = vadd.f32 %v1082_v47, %v957_v17 }
 0x1bc   : > { %v1297_v42 = vpop.permute.xlu0 %1296  ;;  %825 = vrot.lane.b32.xlu2 %v2349_v18, %s1831_s29 }
 0x1bd   : > { %604 = vrot.lane.b32.xlu1 %v2347_v3, %s1831_s29  ;;  %v1360_v52 = vsel %vm221_vm0, %v1342_v39, %v1297_v42 }
 0x1be   : > { %1730 = vmatmul.msk.f32.gmra.mxu3 %vm885_vm3, %v1360_v52  ;;  %v2375_v63 = vpop.permute.xlu2 %815 }
 0x1bf   : > { %v591_v45 = vpop.permute.xlu1 %590 }
 0x1c0   : > { %v652_v60 = vsel %vm221_vm0, %v634_v51, %v591_v45  ;;  %v1088_v45 = vpop.f32.mrf.mxu2 }
 0x1c1   : > { %1711 = vmatmul.msk.f32.gmra.mxu2 %vm885_vm3, %v652_v60  ;;  %v1445_v50 = vpop.f32.mrf.mxu3  ;;  %v960_v44 = vpop.f32.mrf.mxu1 }
 0x1c2   : > { %v1499_v54 = vadd.f32 %v1445_v50, %v1083_v48  ;;  %v1086_v19 = vadd.f32 %v1085_v15, %v960_v44 }
 0x1c4   : > { %v1517_v56 = vmax.f32 %v1499_v54, 0.0  ;;  %v523_v61 = vpop.permute.xlu0 %522 }
 0x1c5   : > { %751 = vrot.lane.b32.xlu1 %v681_v55, %s1832_s30  ;;  %v636_v27 = vsel %vm400_vm1, %v438_v23, %v523_v61 }
 0x1c6   : > { %1535 = vst.msk [vmem:[%s2366_s7] sm:$0xff] %vm400_vm1, %v1517_v56  ;;  %v1231_v11 = vpop.permute.xlu2 %1230 }
 0x1c7   : > { %v738_v4 = vpop.permute.xlu1 %737  ;;  %v1345_v39 = vsel %vm400_vm1, %v2215_v62, %v1231_v11 }
 0x1c8   : > { %v854_v29 = vsel %vm400_vm1, %v2180_v33, %v738_v4  ;;  %v635_v33 = vsel %vm400_vm1, %v437_v2, %v521_v30 }
 0x1c9   : > { %v872_v38 = vsel %vm221_vm0, %v854_v29, %v2274_v43 }
 0x1ca   : > { %1692 = vmatmul.msk.f32.gmra.mxu1 %vm885_vm3, %v872_v38 }
 0x1cc   : > { %v1299_v6 = vpop.permute.xlu0 %1298  ;;  %v1091_v55 = vpop.f32.mrf.mxu2 }
 0x1cd   : > { %753 = vrot.lane.b32.xlu1 %v682_v12, %s1832_s30  ;;  %v1361_v7 = vsel %vm221_vm0, %v1343_v0, %v1299_v6 }
 0x1ce   : > { %1731 = vmatmul.msk.f32.gmra.mxu3 %vm885_vm3, %v1361_v7  ;;  %v2394_v26 = vpop.permute.xlu2 %817  ;;  %v440_v7 = vld [vmem:[#allocation2 + $0x70] sm:$0xff] }
 0x1cf   : > { %v593_v10 = vpop.permute.xlu1 %592 }
 0x1d0   : > { %v653_v43 = vsel %vm221_vm0, %v635_v33, %v593_v10 }
 0x1d1   : > { %1712 = vmatmul.msk.f32.gmra.mxu2 %vm885_vm3, %v653_v43 }
 0x1d4   : > { %v525_v8 = vpop.permute.xlu0 %524 }
 0x1d5   : > { %v637_v52 = vsel %vm400_vm1, %v439_v13, %v525_v8 }
 0x1d6   : > { %v1233_v35 = vpop.permute.xlu2 %1232 }
 0x1d7   : > { %v740_v5 = vpop.permute.xlu1 %739  ;;  %v1346_v0 = vsel %vm400_vm1, %v2249_v25, %v1233_v35  ;;  %v1094_v25 = vpop.f32.mrf.mxu2 }
 0x1d8   : > { %v855_v21 = vsel %vm400_vm1, %v2204_v53, %v740_v5 }
 0x1d9   : > { %v873_v14 = vsel %vm221_vm0, %v855_v21, %v2305_v16 }
 0x1da   : > { %1693 = vmatmul.msk.f32.gmra.mxu1 %vm885_vm3, %v873_v14 }
 0x1dc   : > { %v1301_v59 = vpop.permute.xlu0 %1300 }
 0x1dd   : > { %v1448_v49 = vpop.f32.mrf.mxu3  ;;  %v1362_v53 = vsel %vm221_vm0, %v1344_v20, %v1301_v59 }
 0x1de   : > { %v1500_v36 = vadd.f32 %v1448_v49, %v1086_v19  ;;  %1732 = vmatmul.msk.f32.gmra.mxu3 %vm885_vm3, %v1362_v53 }
 0x1df   : > { %v595_v40 = vpop.permute.xlu1 %594 }
 0x1e0   : > { %v1518_v16 = vmax.f32 %v1500_v36, 0.0  ;;  %v654_v30 = vsel %vm221_vm0, %v636_v27, %v595_v40  ;;  %v441_v36 = vld [vmem:[#allocation2 + $0x78] sm:$0xff] }
 0x1e1   : > { %1713 = vmatmul.msk.f32.gmra.mxu2 %vm885_vm3, %v654_v30 }
 0x1e2   : > { %1536 = vst.msk [vmem:[%s2366_s7 + $0x8] sm:$0xff] %vm400_vm1, %v1518_v16 }
 0x1e4   : > { %v527_v41 = vpop.permute.xlu0 %526 }
 0x1e7   : > { %v742_v32 = vpop.permute.xlu1 %741 }
 0x1e8   : > { %v856_v9 = vsel %vm400_vm1, %v2234_v22, %v742_v32  ;;  %v963_v22 = vpop.f32.mrf.mxu1 }
 0x1e9   : > { %v874_v34 = vsel %vm221_vm0, %v856_v9, %v2338_v31  ;;  %v2415_v31 = vpop.permute.xlu2 %819  ;;  %v1089_v46 = vadd.f32 %v1088_v45, %v963_v22  ;;  %v442_v45 = vld [vmem:[#allocation2 + $0x80] sm:$0xff] }
 0x1ea   : > { %1694 = vmatmul.msk.f32.gmra.mxu1 %vm885_vm3, %v874_v34 }
 0x1ec   : > { %v1303_v42 = vpop.permute.xlu0 %1302  ;;  %v1097_v16 = vpop.f32.mrf.mxu2 }
 0x1ed   : > { %v1363_v17 = vsel %vm221_vm0, %v1345_v39, %v1303_v42 }
 0x1ee   : > { %1733 = vmatmul.msk.f32.gmra.mxu3 %vm885_vm3, %v1363_v17 }
 0x1ef   : > { %v597_v51 = vpop.permute.xlu1 %596 }
 0x1f0   : > { %v655_v47 = vsel %vm221_vm0, %v637_v52, %v597_v51  ;;  %v966_v56 = vpop.f32.mrf.mxu1 }
 0x1f1   : > { %1714 = vmatmul.msk.f32.gmra.mxu2 %vm885_vm3, %v655_v47  ;;  %v1092_v29 = vadd.f32 %v1091_v55, %v966_v56  ;;  %v1235_v38 = vpop.permute.xlu2 %1234 }
 0x1f2   : > { %v1347_v59 = vsel %vm400_vm1, %v2278_v24, %v1235_v38 }
 0x1f4   : > { %v1451_v62 = vpop.f32.mrf.mxu3  ;;  %v529_v48 = vpop.permute.xlu0 %528 }
 0x1f5   : > { %v1501_v60 = vadd.f32 %v1451_v62, %v1089_v46 }
 0x1f7   : > { %v1519_v50 = vmax.f32 %v1501_v60, 0.0  ;;  %v744_v54 = vpop.permute.xlu1 %743 }
 0x1f8   : > { %v857_v61 = vsel %vm400_vm1, %v2263_v37, %v744_v54  ;;  %v638_v37 = vsel %vm400_vm1, %v440_v7, %v527_v41 }
 0x1f9   : > { %1538 = vst.msk [vmem:[%s2366_s7 + $0xe] sm:$0xfc] %vm1537_vm4, %v1519_v50  ;;  %v875_v4 = vsel %vm221_vm0, %v857_v61, %v2375_v63  ;;  %v969_v63 = vpop.f32.mrf.mxu1  ;;  %v822_v14 = vpop.permute.xlu2 %821 }
 0x1fa   : > { %1695 = vmatmul.msk.f32.gmra.mxu1 %vm885_vm3, %v875_v4  ;;  %v1095_v8 = vadd.f32 %v1094_v25, %v969_v63 }
 0x1fc   : > { %v1454_v12 = vpop.f32.mrf.mxu3  ;;  %v1305_v2 = vpop.permute.xlu0 %1304 }
 0x1fd   : > { %v1502_v6 = vadd.f32 %v1454_v12, %v1092_v29  ;;  %v1364_v33 = vsel %vm221_vm0, %v1346_v0, %v1305_v2  ;;  %v1153_v29 = vld [vmem:[#allocation2 + $0xac] sm:$0xff] }
 0x1fe   : > { %1734 = vmatmul.msk.f32.gmra.mxu3 %vm885_vm3, %v1364_v33  ;;  %v443_v0 = vld [vmem:[#allocation2 + $0x88] sm:$0xff] }
 0x1ff   : > { %v1520_v10 = vmax.f32 %v1502_v6, 0.0  ;;  %v599_v43 = vpop.permute.xlu1 %598 }
 0x200   : > { %v656_v11 = vsel %vm221_vm0, %v638_v37, %v599_v43 }
 0x201   : > { %1539 = vst.msk [vmem:[%s2366_s7 + $0x16] sm:$0xff] %vm400_vm1, %v1520_v10  ;;  %1715 = vmatmul.msk.f32.gmra.mxu2 %vm885_vm3, %v656_v11 }
 0x204   : > { %v1457_v5 = vpop.f32.mrf.mxu3  ;;  %v531_v44 = vpop.permute.xlu0 %530 }
 0x205   : > { %v1503_v21 = vadd.f32 %v1457_v5, %v1095_v8  ;;  %v640_v46 = vsel %vm400_vm1, %v442_v45, %v531_v44  ;;  %v663_v8 = vld [vmem:[#allocation2 + $0x92] sm:$0xff] }
 0x207   : > { %v1521_v15 = vmax.f32 %v1503_v21, 0.0  ;;  %v746_v19 = vpop.permute.xlu1 %745  ;;  %v972_v53 = vpop.f32.mrf.mxu1 }
 0x208   : > { %v858_v20 = vsel %vm400_vm1, %v2292_v1, %v746_v19  ;;  %v639_v1 = vsel %vm400_vm1, %v441_v36, %v529_v48  ;;  %v1098_v41 = vadd.f32 %v1097_v16, %v972_v53 }
 0x209   : > { %1541 = vst.msk [vmem:[%s2366_s7 + $0x1e] sm:$0x3] %vm1540_vm5, %v1521_v15  ;;  %v876_v49 = vsel %vm221_vm0, %v858_v20, %v2394_v26  ;;  %v1237_v26 = vpop.permute.xlu2 %1236 }
 0x20a   : > { %1543 = vst.msk [vmem:[%s2366_s7 + $0x1c] sm:$0xf0] %vm1542_vm6, %v1521_v15  ;;  %1696 = vmatmul.msk.f32.gmra.mxu1 %vm885_vm3, %v876_v49  ;;  %v1348_v35 = vsel %vm400_vm1, %v2333_v28, %v1237_v26  ;;  %v664_v15 = vld [vmem:[#allocation2 + $0x9a] sm:$0xff] }
 0x20c   : > { %v1307_v23 = vpop.permute.xlu0 %1306 }
 0x20d   : > { %v1365_v27 = vsel %vm221_vm0, %v1347_v59, %v1307_v23 }
 0x20e   : > { %1735 = vmatmul.msk.f32.gmra.mxu3 %vm885_vm3, %v1365_v27 }
 0x20f   : > { %v601_v40 = vpop.permute.xlu1 %600 }
 0x210   : > { %v657_v30 = vsel %vm221_vm0, %v639_v1, %v601_v40 }
 0x211   : > { %1716 = vmatmul.msk.f32.gmra.mxu2 %vm885_vm3, %v657_v30  ;;  %v1460_v32 = vpop.f32.mrf.mxu3  ;;  %v1239_v52 = vpop.permute.xlu2 %1238 }
 0x212   : > { %v1504_v24 = vadd.f32 %v1460_v32, %v1098_v41  ;;  %v1349_v28 = vsel %vm400_vm1, %v2349_v18, %v1239_v52 }
 0x214   : > { %v1522_v9 = vmax.f32 %v1504_v24, 0.0  ;;  %v1309_v34 = vpop.permute.xlu0 %1308 }
 0x215   : > { %v1366_v39 = vsel %vm221_vm0, %v1348_v35, %v1309_v34 }
 0x216   : > { %1544 = vst.msk [vmem:[%s2366_s7 + $0x24] sm:$0xff] %vm400_vm1, %v1522_v9  ;;  %1736 = vmatmul.msk.f32.gmra.mxu3 %vm885_vm3, %v1366_v39 }
 0x217   : > { %v748_v42 = vpop.permute.xlu1 %747  ;;  %v975_v22 = vpop.f32.mrf.mxu1 }
 0x218   : > { %v859_v13 = vsel %vm400_vm1, %v2318_v57, %v748_v42  ;;  %v1100_v57 = vpop.f32.mrf.mxu2 }
 0x219   : > { %v877_v17 = vsel %vm221_vm0, %v859_v13, %v2415_v31  ;;  %v1101_v60 = vadd.f32 %v1100_v57, %v975_v22  ;;  %v1243_v4 = vpop.permute.xlu2 %1242 }
 0x21a   : > { %1697 = vmatmul.msk.f32.gmra.mxu1 %vm885_vm3, %v877_v17  ;;  %v1351_v38 = vsel %vm400_vm1, %v1153_v29, %v1243_v4 }
 0x21c   : > { %v1311_v51 = vpop.permute.xlu0 %1310 }
 0x21d   : > { %v1367_v47 = vsel %vm221_vm0, %v1349_v28, %v1311_v51 }
 0x21e   : > { %1737 = vmatmul.msk.f32.gmra.mxu3 %vm885_vm3, %v1367_v47 }
 0x21f   : > { %v603_v62 = vpop.permute.xlu1 %602 }
 0x220   : > { %v658_v31 = vsel %vm221_vm0, %v640_v46, %v603_v62 }
 0x221   : > { %1717 = vmatmul.msk.f32.gmra.mxu2 %vm885_vm3, %v658_v31  ;;  %v1463_v48 = vpop.f32.mrf.mxu3  ;;  %v824_v11 = vpop.permute.xlu2 %823 }
 0x222   : > { %v1505_v18 = vadd.f32 %v1463_v48, %v1101_v60 }
 0x224   : > { %v1523_v50 = vmax.f32 %v1505_v18, 0.0  ;;  %v533_v54 = vpop.permute.xlu0 %532 }
 0x226   : > { %1545 = vst.msk [vmem:[%s2366_s7 + $0x2c] sm:$0xf] %vm423_vm2, %v1523_v50  ;;  %1738 = vmatmul.msk.f32.gmra.mxu3 %vm885_vm3, %v2065_v58  ;;  %v641_v58 = vsel %vm400_vm1, %v443_v0, %v533_v54 }
 0x227   : > { %v750_v55 = vpop.permute.xlu1 %749  ;;  %1547 = vst.msk [vmem:[%s2366_s7 + $0x2a] sm:$0xc0] %vm1546_vm7, %v1523_v50  ;;  %v978_v6 = vpop.f32.mrf.mxu1 }
 0x228   : > { %v860_v56 = vsel %vm400_vm1, %v2347_v3, %v750_v55  ;;  %v1103_v3 = vpop.f32.mrf.mxu2 }
 0x229   : > { %v878_v61 = vsel %vm221_vm0, %v860_v56, %v822_v14  ;;  %v1104_v37 = vadd.f32 %v1103_v3, %v978_v6  ;;  %v826_v19 = vpop.permute.xlu2 %825 }
 0x22a   : > { %1698 = vmatmul.msk.f32.gmra.mxu1 %vm885_vm3, %v878_v61 }
 0x22c   : > { %v1315_v12 = vpop.permute.xlu0 %1314 }
 0x22d   : > { %v1369_v2 = vsel %vm221_vm0, %v1351_v38, %v1315_v12 }
 0x22e   : > { %1739 = vmatmul.msk.f32.gmra.mxu3 %vm885_vm3, %v1369_v2 }
 0x22f   : > { %v605_v7 = vpop.permute.xlu1 %604 }
 0x230   : > { %v659_v33 = vsel %vm221_vm0, %v641_v58, %v605_v7  ;;  %v1106_v20 = vpop.f32.mrf.mxu2 }
 0x231   : > { %1718 = vmatmul.msk.f32.gmra.mxu2 %vm885_vm3, %v659_v33  ;;  %v1466_v10 = vpop.f32.mrf.mxu3 }
 0x232   : > { %v1506_v43 = vadd.f32 %v1466_v10, %v1104_v37 }
 0x234   : > { %v1524_v63 = vmax.f32 %v1506_v43, 0.0 }
 0x236   : > { %1548 = vst.msk [vmem:[%s2366_s7 + $0x32] sm:$0xff] %vm400_vm1, %v1524_v63 }
 0x237   : > { %v752_v25 = vpop.permute.xlu1 %751  ;;  %v981_v44 = vpop.f32.mrf.mxu1 }
 0x238   : > { %v861_v5 = vsel %vm400_vm1, %v663_v8, %v752_v25  ;;  %v1107_v59 = vadd.f32 %v1106_v20, %v981_v44  ;;  %v1109_v40 = vpop.f32.mrf.mxu2 }
 0x239   : > { %v879_v21 = vsel %vm221_vm0, %v861_v5, %v824_v11 }
 0x23a   : > { %1699 = vmatmul.msk.f32.gmra.mxu1 %vm885_vm3, %v879_v21 }
 0x23f   : > { %v754_v14 = vpop.permute.xlu1 %753 }
 0x240   : > { %v862_v49 = vsel %vm400_vm1, %v664_v15, %v754_v14 }
 0x241   : > { %v880_v23 = vsel %vm221_vm0, %v862_v49, %v826_v19  ;;  %v1469_v36 = vpop.f32.mrf.mxu3 }
 0x242   : > { %1700 = vmatmul.msk.f32.gmra.mxu1 %vm885_vm3, %v880_v23  ;;  %v1507_v53 = vadd.f32 %v1469_v36, %v1107_v59 }
 0x244   : > { %v1525_v27 = vmax.f32 %v1507_v53, 0.0  ;;  %v1112_v24 = vpop.f32.mrf.mxu2 }
 0x246   : > { %1550 = vst.msk [vmem:[%s2366_s7 + $0x3a] sm:$0x3f] %vm1549_vm8, %v1525_v27 }
 0x247   : > { %v984_v1 = vpop.f32.mrf.mxu1 }
 0x248   : > { %v1110_v16 = vadd.f32 %v1109_v40, %v984_v1 }
 0x251   : > { %v1472_v26 = vpop.f32.mrf.mxu3 }
 0x252   : > { %v1508_v30 = vadd.f32 %v1472_v26, %v1110_v16 }
 0x254   : > { %v1526_v41 = vmax.f32 %v1508_v30, 0.0  ;;  %v1115_v13 = vpop.f32.mrf.mxu2 }
 0x256   : > { %1551 = vst.msk [vmem:[%s2366_s7 + $0x40] sm:$0xff] %vm400_vm1, %v1526_v41 }
 0x257   : > { %v987_v32 = vpop.f32.mrf.mxu1 }
 0x258   : > { %v1113_v35 = vadd.f32 %v1112_v24, %v987_v32 }
 0x261   : > { %v1475_v9 = vpop.f32.mrf.mxu3 }
 0x262   : > { %v1509_v34 = vadd.f32 %v1475_v9, %v1113_v35 }
 0x264   : > { %v1527_v39 = vmax.f32 %v1509_v34, 0.0  ;;  %v1118_v22 = vpop.f32.mrf.mxu2 }
 0x266   : > { %1552 = vst.msk [vmem:[%s2366_s7 + $0x48] sm:$0xff] %vm400_vm1, %v1527_v39 }
 0x267   : > { %v990_v42 = vpop.f32.mrf.mxu1 }
 0x268   : > { %v1116_v17 = vadd.f32 %v1115_v13, %v990_v42 }
 0x271   : > { %v1478_v52 = vpop.f32.mrf.mxu3 }
 0x272   : > { %v1510_v28 = vadd.f32 %v1478_v52, %v1116_v17 }
 0x274   : > { %v1528_v51 = vmax.f32 %v1510_v28, 0.0  ;;  %v1121_v60 = vpop.f32.mrf.mxu2 }
 0x276   : > { %1553 = vst.msk [vmem:[%s2366_s7 + $0x4e] sm:$0xfc] %vm1537_vm4, %v1528_v51 }
 0x277   : > { %v993_v45 = vpop.f32.mrf.mxu1 }
 0x278   : > { %v1119_v47 = vadd.f32 %v1118_v22, %v993_v45 }
 0x281   : > { %v1481_v46 = vpop.f32.mrf.mxu3 }
 0x282   : > { %v1511_v62 = vadd.f32 %v1481_v46, %v1119_v47 }
 0x284   : > { %v1529_v57 = vmax.f32 %v1511_v62, 0.0  ;;  %v1124_v55 = vpop.f32.mrf.mxu2 }
 0x286   : > { %1554 = vst.msk [vmem:[%s2366_s7 + $0x56] sm:$0xff] %vm400_vm1, %v1529_v57 }
 0x287   : > { %v996_v31 = vpop.f32.mrf.mxu1 }
 0x288   : > { %v1122_v48 = vadd.f32 %v1121_v60, %v996_v31 }
 0x291   : > { %v1484_v18 = vpop.f32.mrf.mxu3 }
 0x292   : > { %v1512_v50 = vadd.f32 %v1484_v18, %v1122_v48 }
 0x294   : > { %v1530_v54 = vmax.f32 %v1512_v50, 0.0  ;;  %v1127_v12 = vpop.f32.mrf.mxu2 }
 0x296   : > { %1555 = vst.msk [vmem:[%s2366_s7 + $0x5e] sm:$0x3] %vm1540_vm5, %v1530_v54 }
 0x297   : > { %v999_v56 = vpop.f32.mrf.mxu1  ;;  %1556 = vst.msk [vmem:[%s2366_s7 + $0x5c] sm:$0xf0] %vm1542_vm6, %v1530_v54 }
 0x298   : > { %v1125_v61 = vadd.f32 %v1124_v55, %v999_v56 }
 0x299   : > { %v1487_v4 = vpop.f32.mrf.mxu3 }
 0x29a   : > { %v1513_v29 = vadd.f32 %v1487_v4, %v1125_v61 }
 0x29c   : > { %v1531_v38 = vmax.f32 %v1513_v29, 0.0 }
 0x29e   : > { %1557 = vst.msk [vmem:[%s2366_s7 + $0x64] sm:$0xff] %vm400_vm1, %v1531_v38 }
 0x2a1   : > { %v1490_v2 = vpop.f32.mrf.mxu3 }
 0x2a4   : > { %v1130_v3 = vpop.f32.mrf.mxu2 }
 0x2a7   : > { %v1002_v0 = vpop.f32.mrf.mxu1 }
 0x2a8   : > { %v1128_v6 = vadd.f32 %v1127_v12, %v1002_v0 }
 0x2a9   : > { %v1493_v33 = vpop.f32.mrf.mxu3 }
 0x2aa   : > { %v1514_v58 = vadd.f32 %v1490_v2, %v1128_v6 }
 0x2ac   : > { %v1532_v7 = vmax.f32 %v1514_v58, 0.0 }
 0x2ae   : > { %1558 = vst.msk [vmem:[%s2366_s7 + $0x6c] sm:$0xf] %vm423_vm2, %v1532_v7 }
 0x2af   : > { %1559 = vst.msk [vmem:[%s2366_s7 + $0x6a] sm:$0xc0] %vm1546_vm7, %v1532_v7 }
 0x2b1   : > { %v1496_v5 = vpop.f32.mrf.mxu3 }
 0x2b4   : > { %v1133_v11 = vpop.f32.mrf.mxu2 }
 0x2b7   : > { %v1005_v37 = vpop.f32.mrf.mxu1 }
 0x2b8   : > { %v1131_v10 = vadd.f32 %v1130_v3, %v1005_v37 }
 0x2ba   : > { %v1515_v43 = vadd.f32 %v1493_v33, %v1131_v10 }
 0x2bc   : > { %v1533_v63 = vmax.f32 %v1515_v43, 0.0 }
 0x2be   : > { %1560 = vst.msk [vmem:[%s2366_s7 + $0x72] sm:$0xff] %vm400_vm1, %v1533_v63 }
 0x2bf   : > { %v1008_v25 = vpop.f32.mrf.mxu1 }
 0x2c0   : > { %v1134_v8 = vadd.f32 %v1133_v11, %v1008_v25 }
 0x2c2   : > { %v1516_v21 = vadd.f32 %v1496_v5, %v1134_v8 }
 0x2c4   : > { %v1534_v44 = vmax.f32 %v1516_v21, 0.0 }
 0x2c6   : > { %1561 = vst.msk [vmem:[%s2366_s7 + $0x7a] sm:$0x3f] %vm1549_vm8, %v1534_v44 }
 0x2c7 PF: > { %s13_s16 = sadd.s32 1, %s1828_s16   ;;  %s2534_s12 = smov %s1820_s14 }
 0x2c8   : > { %p10_p7 = scmp.ge.s32.totalorder %s13_s16, 6   ;;  %s2535_s13 = smov %s1824_s15 }
 0x2c9   : > { %s2536_s14 = smov %s2539_s17  ;;  %s2537_s15 = smov %s2543_s18 }
 0x2ca   :  { %12 = sbr.rel (!%p10_p7) target bundleno = 3 (0x3), region = 65 }

</bundles_post_ra>
